<compile_context>
chip_gen: v5e
topology: v5e:2x2
jax: 0.10.0
libtpu: 0.0.40
codegen_flags: <defaults>
</compile_context>

<pallas_src>
import functools

import jax
import jax.numpy as jnp
from jax import lax
from jax.experimental import pallas as pl
from jax.experimental.pallas import tpu as pltpu


def _round_up(x, m):
    return ((x + m - 1) // m) * m


def lstm_kernel(x_ref, wih_ref, whh_ref, b_ref, wfc_ref, bfc_ref,
                out_ref, gx_scr):
    """Shapes (all padded in the wrapper):
       x_ref:   (T*Bp, E)    time-major flattened embedded input
       wih_ref: (E, 4*Hp)    input->gates weights (per-gate blocks lane-padded)
       whh_ref: (Hp, 4*Hp)   hidden->gates weights
       b_ref:   (1, 4*Hp)    combined gate bias (zeros in padded lanes)
       wfc_ref: (Hp, Op)     final FC weights
       bfc_ref: (1, Op)      FC bias, padded lanes = -1e30 (masks log_softmax)
       out_ref: (Bp, Op)     log-probabilities
       gx_scr:  (T*Bp, 4*Hp) f32 scratch: hoisted input projection
    """
    TBp, _ = x_ref.shape
    Hp = whh_ref.shape[0]
    Bp = out_ref.shape[0]
    T = TBp // Bp
    w_dtype = whh_ref.dtype

    # ---- hoisted input projection: one big GEMM over all timesteps ----
    gx_scr[...] = (
        jnp.dot(x_ref[...], wih_ref[...], preferred_element_type=jnp.float32)
        + b_ref[...])

    # ---- serial recurrence over time (f32 state, lane-padded hidden) ----
    def step(t, carry):
        h, c = carry
        row = pl.multiple_of(t * Bp, Bp)
        gates = gx_scr[pl.ds(row, Bp), :] + jnp.dot(
            h.astype(w_dtype), whh_ref[...],
            preferred_element_type=jnp.float32)              # (Bp, 4*Hp)
        # PyTorch gate order: input, forget, cell(g), output.  Each slice is a
        # full 128-lane-aligned block (Hp is a multiple of 128).
        i_g = jax.nn.sigmoid(gates[:, 0 * Hp:1 * Hp])
        f_g = jax.nn.sigmoid(gates[:, 1 * Hp:2 * Hp])
        g_g = jnp.tanh(gates[:, 2 * Hp:3 * Hp])
        o_g = jax.nn.sigmoid(gates[:, 3 * Hp:4 * Hp])
        c = f_g * c + i_g * g_g
        h = o_g * jnp.tanh(c)
        return h, c

    h0 = jnp.zeros((Bp, Hp), jnp.float32)
    c0 = jnp.zeros((Bp, Hp), jnp.float32)
    h_t, _ = lax.fori_loop(0, T, step, (h0, c0), unroll=True)

    # ---- FC + log_softmax on the final hidden state (lane-dense, Op=128k) ----
    logits = (jnp.dot(h_t.astype(w_dtype), wfc_ref[...],
                      preferred_element_type=jnp.float32)
              + bfc_ref[...])                                # (Bp, Op)
    m = jnp.max(logits, axis=-1, keepdims=True)
    lse = jnp.log(jnp.sum(jnp.exp(logits - m), axis=-1, keepdims=True)) + m
    out_ref[...] = logits - lse


@functools.partial(jax.jit, static_argnames=("param_dtype",))
def lstm_forward(x_tokens, emb_table, w_ih, w_hh, b_ih, b_hh, w_fc, b_fc,
                 param_dtype=jnp.float32):
    # --- glue: embedding lookup (gather) in plain JAX ---
    # TODO(synk): could be fused into the kernel via scalar-prefetch row gather.
    x_emb = jnp.take(emb_table, x_tokens, axis=0)        # (T, B, E) f32

    T, B, E = x_emb.shape
    H = w_hh.shape[1]
    O = w_fc.shape[0]

    Bp = _round_up(B, 8)       # sublane alignment for the per-step batch slab
    Hp = _round_up(H, 128)     # lane alignment of each gate block
    Op = _round_up(O, 128)     # lane-dense output
    G = 4 * Hp

    # time-major flattened input, batch padded to a sublane multiple
    if Bp != B:
        x_emb = jnp.pad(x_emb, ((0, 0), (0, Bp - B), (0, 0)))
    x2d = x_emb.reshape(T * Bp, E).astype(param_dtype)

    # Lane-pad each of the 4 gate blocks to Hp so i/f/g/o slices are
    # 128-aligned in the kernel.  Padded columns have zero weight and zero
    # bias -> padded h/c lanes stay exactly 0 through the recurrence.
    w_ih_t = w_ih.T                                       # (E, 4H)
    w_hh_t = w_hh.T                                       # (H, 4H)
    bias = b_ih + b_hh                                    # (4H,)

    wih_p = jnp.zeros((E, G), param_dtype)
    whh_p = jnp.zeros((Hp, G), param_dtype)
    bias_p = jnp.zeros((1, G), jnp.float32)
    for g in range(4):
        src = slice(g * H, (g + 1) * H)
        dst = slice(g * Hp, g * Hp + H)
        wih_p = wih_p.at[:, dst].set(w_ih_t[:, src].astype(param_dtype))
        whh_p = whh_p.at[:H, dst].set(w_hh_t[:, src].astype(param_dtype))
        bias_p = bias_p.at[0, dst].set(bias[src])

    wfc_p = jnp.zeros((Hp, Op), param_dtype).at[:H, :O].set(
        w_fc.T.astype(param_dtype))
    # padded logit lanes get a huge negative bias so log_softmax ignores them
    bfc_p = jnp.full((1, Op), -1e30, jnp.float32).at[0, :O].set(b_fc)

    out_padded = pl.pallas_call(
        lstm_kernel,
        out_shape=jax.ShapeDtypeStruct((Bp, Op), jnp.float32),
        grid_spec=pltpu.PrefetchScalarGridSpec(
            num_scalar_prefetch=0,
            grid=(1,),
            in_specs=[
                pl.BlockSpec((T * Bp, E), lambda i: (0, 0)),
                pl.BlockSpec((E, G), lambda i: (0, 0)),
                pl.BlockSpec((Hp, G), lambda i: (0, 0)),
                pl.BlockSpec((1, G), lambda i: (0, 0)),
                pl.BlockSpec((Hp, Op), lambda i: (0, 0)),
                pl.BlockSpec((1, Op), lambda i: (0, 0)),
            ],
            out_specs=pl.BlockSpec((Bp, Op), lambda i: (0, 0)),
            scratch_shapes=[
                pltpu.VMEM((T * Bp, G), jnp.float32),   # hoisted gates_x
            ],
        ),
        compiler_params=pltpu.CompilerParams(
            dimension_semantics=("arbitrary",),
            vmem_limit_bytes=64 * 1024 * 1024),
    )(x2d, wih_p, whh_p, bias_p, wfc_p, bfc_p)

    return out_padded[:B, :O]


def lstm_forward_ref(x_tokens, emb_table, w_ih, w_hh, b_ih, b_hh, w_fc, b_fc):
    """Pure-JAX reference (lax.scan) for correctness checking."""
    x_emb = jnp.take(emb_table, x_tokens, axis=0)
    T, B, E = x_emb.shape
    H = w_hh.shape[1]

    def step(carry, x_t):
        h, c = carry
        gates = x_t @ w_ih.T + h @ w_hh.T + b_ih + b_hh
        i_g = jax.nn.sigmoid(gates[:, 0 * H:1 * H])
        f_g = jax.nn.sigmoid(gates[:, 1 * H:2 * H])
        g_g = jnp.tanh(gates[:, 2 * H:3 * H])
        o_g = jax.nn.sigmoid(gates[:, 3 * H:4 * H])
        c = f_g * c + i_g * g_g
        h = o_g * jnp.tanh(c)
        return (h, c), None

    h0 = jnp.zeros((B, H), jnp.float32)
    (h_t, _), _ = jax.lax.scan(step, (h0, h0), x_emb)
    logits = h_t @ w_fc.T + b_fc
    return jax.nn.log_softmax(logits, axis=-1)


if __name__ == "__main__":
    # small shapes consistent with the module; T == B (see note above)
    T, B = 8, 8
    VOCAB, E, H, O = 100, 32, 32, 8

    key = jax.random.PRNGKey(0)
    keys = jax.random.split(key, 8)

    x_tokens = jax.random.randint(keys[0], (T, B), 0, VOCAB, dtype=jnp.int32)

    emb_table = jax.random.normal(keys[1], (VOCAB, E), jnp.float32)
    s = 1.0 / jnp.sqrt(H)
    w_ih = jax.random.uniform(keys[2], (4 * H, E), jnp.float32, -s, s)
    w_hh = jax.random.uniform(keys[3], (4 * H, H), jnp.float32, -s, s)
    b_ih = jax.random.uniform(keys[4], (4 * H,), jnp.float32, -s, s)
    b_hh = jax.random.uniform(keys[5], (4 * H,), jnp.float32, -s, s)
    w_fc = jax.random.uniform(keys[6], (O, H), jnp.float32, -s, s)
    b_fc = jax.random.uniform(keys[7], (O,), jnp.float32, -s, s)

    args = (x_tokens, emb_table, w_ih, w_hh, b_ih, b_hh, w_fc, b_fc)

    # f32 path: strict check vs pure-JAX reference
    y = jax.block_until_ready(lstm_forward(*args))
    y_ref = lstm_forward_ref(*args)
    assert y.shape == (B, O)
    assert jnp.allclose(y, y_ref, atol=1e-4, rtol=1e-4), "f32 mismatch vs reference"

    # bf16 weights/activations path (f32 accumulation + f32 h/c state)
    y_bf16 = jax.block_until_ready(lstm_forward(*args, param_dtype=jnp.bfloat16))
    assert y_bf16.shape == (B, O)
    assert bool(jnp.all(jnp.isfinite(y_bf16)))
    assert jnp.allclose(y_bf16, y_ref, atol=1e-1, rtol=1e-1), "bf16 drift too large"

    print("KERNEL_OK")
</pallas_src>

<mosaic_0001>
module attributes {stable_mosaic.version = 11 : i64} {
  func.func @lstm_kernel(%arg0: i32, %arg1: memref<64x32xf32, #tpu.memory_space<vmem>>, %arg2: memref<32x512xf32, #tpu.memory_space<vmem>>, %arg3: memref<128x512xf32, #tpu.memory_space<vmem>>, %arg4: memref<1x512xf32, #tpu.memory_space<vmem>>, %arg5: memref<128x128xf32, #tpu.memory_space<vmem>>, %arg6: memref<1x128xf32, #tpu.memory_space<vmem>>, %arg7: memref<8x128xf32, #tpu.memory_space<vmem>>, %arg8: memref<64x512xf32, #tpu.memory_space<vmem>>) attributes {dimension_semantics = [#tpu.dimension_semantics<arbitrary>], iteration_bounds = array<i64: 1>, scalar_prefetch = 0 : i64, scratch_operands = 1 : i64, tpu.core_type = #tpu.core_type<tc>, window_params = [{pipeline_mode = #tpu.pipeline_mode<synchronous>, transform_indices = @transform_0, window_bounds = array<i64: 64, 32>}, {pipeline_mode = #tpu.pipeline_mode<synchronous>, transform_indices = @transform_1, window_bounds = array<i64: 32, 512>}, {pipeline_mode = #tpu.pipeline_mode<synchronous>, transform_indices = @transform_2, window_bounds = array<i64: 128, 512>}, {pipeline_mode = #tpu.pipeline_mode<synchronous>, transform_indices = @transform_3, window_bounds = array<i64: 1, 512>}, {pipeline_mode = #tpu.pipeline_mode<synchronous>, transform_indices = @transform_4, window_bounds = array<i64: 128, 128>}, {pipeline_mode = #tpu.pipeline_mode<synchronous>, transform_indices = @transform_5, window_bounds = array<i64: 1, 128>}, {pipeline_mode = #tpu.pipeline_mode<synchronous>, transform_indices = @transform_6, window_bounds = array<i64: 8, 128>}]} {
    %c0 = arith.constant 0 : index
    %c0_0 = arith.constant 0 : index
    %0 = vector.load %arg1[%c0, %c0_0] : memref<64x32xf32, #tpu.memory_space<vmem>>, vector<64x32xf32>
    %c0_1 = arith.constant 0 : index
    %c0_2 = arith.constant 0 : index
    %1 = vector.load %arg2[%c0_1, %c0_2] : memref<32x512xf32, #tpu.memory_space<vmem>>, vector<32x512xf32>
    %cst = arith.constant dense<0.000000e+00> : vector<64x512xf32>
    %2 = tpu.matmul %0, %1, %cst {dimension_numbers = #tpu.dot_dimension_numbers<[1], [0], [0], [1], [0, 0, 1, 1], [], []>} : vector<64x32xf32>, vector<32x512xf32>, vector<64x512xf32> -> vector<64x512xf32>
    %c0_3 = arith.constant 0 : index
    %c0_4 = arith.constant 0 : index
    %3 = vector.load %arg4[%c0_3, %c0_4] : memref<1x512xf32, #tpu.memory_space<vmem>>, vector<1x512xf32>
    %4 = vector.broadcast %3 : vector<1x512xf32> to vector<64x512xf32>
    %5 = arith.addf %2, %4 : vector<64x512xf32>
    %c0_5 = arith.constant 0 : index
    %c0_6 = arith.constant 0 : index
    %6 = vector.load %arg8[%c0_5, %c0_6] : memref<64x512xf32, #tpu.memory_space<vmem>>, vector<64x512xf32>
    tpu.vector_store %arg8[%c0_5, %c0_6], %5 {strides = array<i32>} : memref<64x512xf32, #tpu.memory_space<vmem>>, vector<64x512xf32>,
    %cst_7 = arith.constant 0.000000e+00 : f32
    %7 = vector.broadcast %cst_7 : f32 to vector<8x128xf32>
    %cst_8 = arith.constant 0.000000e+00 : f32
    %8 = vector.broadcast %cst_8 : f32 to vector<8x128xf32>
    %c0_i32 = arith.constant 0 : i32
    %c8_i32 = arith.constant 8 : i32
    %9 = arith.muli %c0_i32, %c8_i32 : i32
    %10 = tpu.assume_multiple %9, 8 : i32
    %11 = arith.index_cast %10 : i32 to index
    %c0_9 = arith.constant 0 : index
    %12 = vector.load %arg8[%11, %c0_9] : memref<64x512xf32, #tpu.memory_space<vmem>>, vector<8x512xf32>
    %c0_10 = arith.constant 0 : index
    %c0_11 = arith.constant 0 : index
    %13 = vector.load %arg3[%c0_10, %c0_11] : memref<128x512xf32, #tpu.memory_space<vmem>>, vector<128x512xf32>
    %cst_12 = arith.constant dense<0.000000e+00> : vector<8x512xf32>
    %14 = tpu.matmul %7, %13, %cst_12 {dimension_numbers = #tpu.dot_dimension_numbers<[1], [0], [0], [1], [0, 0, 1, 1], [], []>} : vector<8x128xf32>, vector<128x512xf32>, vector<8x512xf32> -> vector<8x512xf32>
    %15 = arith.addf %12, %14 : vector<8x512xf32>
    %16 = vector.extract_strided_slice %15 {offsets = [0, 0], sizes = [8, 128], strides = [1, 1]} : vector<8x512xf32> to vector<8x128xf32>
    %17 = arith.negf %16 : vector<8x128xf32>
    %18 = math.exp %17 : vector<8x128xf32>
    %cst_13 = arith.constant 1.000000e+00 : f32
    %19 = vector.broadcast %cst_13 : f32 to vector<8x128xf32>
    %20 = arith.addf %19, %18 : vector<8x128xf32>
    %21 = arith.divf %19, %20 : vector<8x128xf32>
    %22 = vector.extract_strided_slice %15 {offsets = [0, 128], sizes = [8, 128], strides = [1, 1]} : vector<8x512xf32> to vector<8x128xf32>
    %23 = arith.negf %22 : vector<8x128xf32>
    %24 = math.exp %23 : vector<8x128xf32>
    %cst_14 = arith.constant 1.000000e+00 : f32
    %25 = vector.broadcast %cst_14 : f32 to vector<8x128xf32>
    %26 = arith.addf %25, %24 : vector<8x128xf32>
    %27 = arith.divf %25, %26 : vector<8x128xf32>
    %28 = vector.extract_strided_slice %15 {offsets = [0, 256], sizes = [8, 128], strides = [1, 1]} : vector<8x512xf32> to vector<8x128xf32>
    %29 = math.tanh %28 : vector<8x128xf32>
    %30 = vector.extract_strided_slice %15 {offsets = [0, 384], sizes = [8, 128], strides = [1, 1]} : vector<8x512xf32> to vector<8x128xf32>
    %31 = arith.negf %30 : vector<8x128xf32>
    %32 = math.exp %31 : vector<8x128xf32>
    %cst_15 = arith.constant 1.000000e+00 : f32
    %33 = vector.broadcast %cst_15 : f32 to vector<8x128xf32>
    %34 = arith.addf %33, %32 : vector<8x128xf32>
    %35 = arith.divf %33, %34 : vector<8x128xf32>
    %36 = arith.mulf %27, %8 : vector<8x128xf32>
    %37 = arith.mulf %21, %29 : vector<8x128xf32>
    %38 = arith.addf %36, %37 : vector<8x128xf32>
    %39 = math.tanh %38 : vector<8x128xf32>
    %40 = arith.mulf %35, %39 : vector<8x128xf32>
    %c1_i32 = arith.constant 1 : i32
    %c8_i32_16 = arith.constant 8 : i32
    %41 = arith.muli %c1_i32, %c8_i32_16 : i32
    %42 = tpu.assume_multiple %41, 8 : i32
    %43 = arith.index_cast %42 : i32 to index
    %c0_17 = arith.constant 0 : index
    %44 = vector.load %arg8[%43, %c0_17] : memref<64x512xf32, #tpu.memory_space<vmem>>, vector<8x512xf32>
    %c0_18 = arith.constant 0 : index
    %c0_19 = arith.constant 0 : index
    %45 = vector.load %arg3[%c0_18, %c0_19] : memref<128x512xf32, #tpu.memory_space<vmem>>, vector<128x512xf32>
    %cst_20 = arith.constant dense<0.000000e+00> : vector<8x512xf32>
    %46 = tpu.matmul %40, %45, %cst_20 {dimension_numbers = #tpu.dot_dimension_numbers<[1], [0], [0], [1], [0, 0, 1, 1], [], []>} : vector<8x128xf32>, vector<128x512xf32>, vector<8x512xf32> -> vector<8x512xf32>
    %47 = arith.addf %44, %46 : vector<8x512xf32>
    %48 = vector.extract_strided_slice %47 {offsets = [0, 0], sizes = [8, 128], strides = [1, 1]} : vector<8x512xf32> to vector<8x128xf32>
    %49 = arith.negf %48 : vector<8x128xf32>
    %50 = math.exp %49 : vector<8x128xf32>
    %cst_21 = arith.constant 1.000000e+00 : f32
    %51 = vector.broadcast %cst_21 : f32 to vector<8x128xf32>
    %52 = arith.addf %51, %50 : vector<8x128xf32>
    %53 = arith.divf %51, %52 : vector<8x128xf32>
    %54 = vector.extract_strided_slice %47 {offsets = [0, 128], sizes = [8, 128], strides = [1, 1]} : vector<8x512xf32> to vector<8x128xf32>
    %55 = arith.negf %54 : vector<8x128xf32>
    %56 = math.exp %55 : vector<8x128xf32>
    %cst_22 = arith.constant 1.000000e+00 : f32
    %57 = vector.broadcast %cst_22 : f32 to vector<8x128xf32>
    %58 = arith.addf %57, %56 : vector<8x128xf32>
    %59 = arith.divf %57, %58 : vector<8x128xf32>
    %60 = vector.extract_strided_slice %47 {offsets = [0, 256], sizes = [8, 128], strides = [1, 1]} : vector<8x512xf32> to vector<8x128xf32>
    %61 = math.tanh %60 : vector<8x128xf32>
    %62 = vector.extract_strided_slice %47 {offsets = [0, 384], sizes = [8, 128], strides = [1, 1]} : vector<8x512xf32> to vector<8x128xf32>
    %63 = arith.negf %62 : vector<8x128xf32>
    %64 = math.exp %63 : vector<8x128xf32>
    %cst_23 = arith.constant 1.000000e+00 : f32
    %65 = vector.broadcast %cst_23 : f32 to vector<8x128xf32>
    %66 = arith.addf %65, %64 : vector<8x128xf32>
    %67 = arith.divf %65, %66 : vector<8x128xf32>
    %68 = arith.mulf %59, %38 : vector<8x128xf32>
    %69 = arith.mulf %53, %61 : vector<8x128xf32>
    %70 = arith.addf %68, %69 : vector<8x128xf32>
    %71 = math.tanh %70 : vector<8x128xf32>
    %72 = arith.mulf %67, %71 : vector<8x128xf32>
    %c2_i32 = arith.constant 2 : i32
    %c8_i32_24 = arith.constant 8 : i32
    %73 = arith.muli %c2_i32, %c8_i32_24 : i32
    %74 = tpu.assume_multiple %73, 8 : i32
    %75 = arith.index_cast %74 : i32 to index
    %c0_25 = arith.constant 0 : index
    %76 = vector.load %arg8[%75, %c0_25] : memref<64x512xf32, #tpu.memory_space<vmem>>, vector<8x512xf32>
    %c0_26 = arith.constant 0 : index
    %c0_27 = arith.constant 0 : index
    %77 = vector.load %arg3[%c0_26, %c0_27] : memref<128x512xf32, #tpu.memory_space<vmem>>, vector<128x512xf32>
    %cst_28 = arith.constant dense<0.000000e+00> : vector<8x512xf32>
    %78 = tpu.matmul %72, %77, %cst_28 {dimension_numbers = #tpu.dot_dimension_numbers<[1], [0], [0], [1], [0, 0, 1, 1], [], []>} : vector<8x128xf32>, vector<128x512xf32>, vector<8x512xf32> -> vector<8x512xf32>
    %79 = arith.addf %76, %78 : vector<8x512xf32>
    %80 = vector.extract_strided_slice %79 {offsets = [0, 0], sizes = [8, 128], strides = [1, 1]} : vector<8x512xf32> to vector<8x128xf32>
    %81 = arith.negf %80 : vector<8x128xf32>
    %82 = math.exp %81 : vector<8x128xf32>
    %cst_29 = arith.constant 1.000000e+00 : f32
    %83 = vector.broadcast %cst_29 : f32 to vector<8x128xf32>
    %84 = arith.addf %83, %82 : vector<8x128xf32>
    %85 = arith.divf %83, %84 : vector<8x128xf32>
    %86 = vector.extract_strided_slice %79 {offsets = [0, 128], sizes = [8, 128], strides = [1, 1]} : vector<8x512xf32> to vector<8x128xf32>
    %87 = arith.negf %86 : vector<8x128xf32>
    %88 = math.exp %87 : vector<8x128xf32>
    %cst_30 = arith.constant 1.000000e+00 : f32
    %89 = vector.broadcast %cst_30 : f32 to vector<8x128xf32>
    %90 = arith.addf %89, %88 : vector<8x128xf32>
    %91 = arith.divf %89, %90 : vector<8x128xf32>
    %92 = vector.extract_strided_slice %79 {offsets = [0, 256], sizes = [8, 128], strides = [1, 1]} : vector<8x512xf32> to vector<8x128xf32>
    %93 = math.tanh %92 : vector<8x128xf32>
    %94 = vector.extract_strided_slice %79 {offsets = [0, 384], sizes = [8, 128], strides = [1, 1]} : vector<8x512xf32> to vector<8x128xf32>
    %95 = arith.negf %94 : vector<8x128xf32>
    %96 = math.exp %95 : vector<8x128xf32>
    %cst_31 = arith.constant 1.000000e+00 : f32
    %97 = vector.broadcast %cst_31 : f32 to vector<8x128xf32>
    %98 = arith.addf %97, %96 : vector<8x128xf32>
    %99 = arith.divf %97, %98 : vector<8x128xf32>
    %100 = arith.mulf %91, %70 : vector<8x128xf32>
    %101 = arith.mulf %85, %93 : vector<8x128xf32>
    %102 = arith.addf %100, %101 : vector<8x128xf32>
    %103 = math.tanh %102 : vector<8x128xf32>
    %104 = arith.mulf %99, %103 : vector<8x128xf32>
    %c3_i32 = arith.constant 3 : i32
    %c8_i32_32 = arith.constant 8 : i32
    %105 = arith.muli %c3_i32, %c8_i32_32 : i32
    %106 = tpu.assume_multiple %105, 8 : i32
    %107 = arith.index_cast %106 : i32 to index
    %c0_33 = arith.constant 0 : index
    %108 = vector.load %arg8[%107, %c0_33] : memref<64x512xf32, #tpu.memory_space<vmem>>, vector<8x512xf32>
    %c0_34 = arith.constant 0 : index
    %c0_35 = arith.constant 0 : index
    %109 = vector.load %arg3[%c0_34, %c0_35] : memref<128x512xf32, #tpu.memory_space<vmem>>, vector<128x512xf32>
    %cst_36 = arith.constant dense<0.000000e+00> : vector<8x512xf32>
    %110 = tpu.matmul %104, %109, %cst_36 {dimension_numbers = #tpu.dot_dimension_numbers<[1], [0], [0], [1], [0, 0, 1, 1], [], []>} : vector<8x128xf32>, vector<128x512xf32>, vector<8x512xf32> -> vector<8x512xf32>
    %111 = arith.addf %108, %110 : vector<8x512xf32>
    %112 = vector.extract_strided_slice %111 {offsets = [0, 0], sizes = [8, 128], strides = [1, 1]} : vector<8x512xf32> to vector<8x128xf32>
    %113 = arith.negf %112 : vector<8x128xf32>
    %114 = math.exp %113 : vector<8x128xf32>
    %cst_37 = arith.constant 1.000000e+00 : f32
    %115 = vector.broadcast %cst_37 : f32 to vector<8x128xf32>
    %116 = arith.addf %115, %114 : vector<8x128xf32>
    %117 = arith.divf %115, %116 : vector<8x128xf32>
    %118 = vector.extract_strided_slice %111 {offsets = [0, 128], sizes = [8, 128], strides = [1, 1]} : vector<8x512xf32> to vector<8x128xf32>
    %119 = arith.negf %118 : vector<8x128xf32>
    %120 = math.exp %119 : vector<8x128xf32>
    %cst_38 = arith.constant 1.000000e+00 : f32
    %121 = vector.broadcast %cst_38 : f32 to vector<8x128xf32>
    %122 = arith.addf %121, %120 : vector<8x128xf32>
    %123 = arith.divf %121, %122 : vector<8x128xf32>
    %124 = vector.extract_strided_slice %111 {offsets = [0, 256], sizes = [8, 128], strides = [1, 1]} : vector<8x512xf32> to vector<8x128xf32>
    %125 = math.tanh %124 : vector<8x128xf32>
    %126 = vector.extract_strided_slice %111 {offsets = [0, 384], sizes = [8, 128], strides = [1, 1]} : vector<8x512xf32> to vector<8x128xf32>
    %127 = arith.negf %126 : vector<8x128xf32>
    %128 = math.exp %127 : vector<8x128xf32>
    %cst_39 = arith.constant 1.000000e+00 : f32
    %129 = vector.broadcast %cst_39 : f32 to vector<8x128xf32>
    %130 = arith.addf %129, %128 : vector<8x128xf32>
    %131 = arith.divf %129, %130 : vector<8x128xf32>
    %132 = arith.mulf %123, %102 : vector<8x128xf32>
    %133 = arith.mulf %117, %125 : vector<8x128xf32>
    %134 = arith.addf %132, %133 : vector<8x128xf32>
    %135 = math.tanh %134 : vector<8x128xf32>
    %136 = arith.mulf %131, %135 : vector<8x128xf32>
    %c4_i32 = arith.constant 4 : i32
    %c8_i32_40 = arith.constant 8 : i32
    %137 = arith.muli %c4_i32, %c8_i32_40 : i32
    %138 = tpu.assume_multiple %137, 8 : i32
    %139 = arith.index_cast %138 : i32 to index
    %c0_41 = arith.constant 0 : index
    %140 = vector.load %arg8[%139, %c0_41] : memref<64x512xf32, #tpu.memory_space<vmem>>, vector<8x512xf32>
    %c0_42 = arith.constant 0 : index
    %c0_43 = arith.constant 0 : index
    %141 = vector.load %arg3[%c0_42, %c0_43] : memref<128x512xf32, #tpu.memory_space<vmem>>, vector<128x512xf32>
    %cst_44 = arith.constant dense<0.000000e+00> : vector<8x512xf32>
    %142 = tpu.matmul %136, %141, %cst_44 {dimension_numbers = #tpu.dot_dimension_numbers<[1], [0], [0], [1], [0, 0, 1, 1], [], []>} : vector<8x128xf32>, vector<128x512xf32>, vector<8x512xf32> -> vector<8x512xf32>
    %143 = arith.addf %140, %142 : vector<8x512xf32>
    %144 = vector.extract_strided_slice %143 {offsets = [0, 0], sizes = [8, 128], strides = [1, 1]} : vector<8x512xf32> to vector<8x128xf32>
    %145 = arith.negf %144 : vector<8x128xf32>
    %146 = math.exp %145 : vector<8x128xf32>
    %cst_45 = arith.constant 1.000000e+00 : f32
    %147 = vector.broadcast %cst_45 : f32 to vector<8x128xf32>
    %148 = arith.addf %147, %146 : vector<8x128xf32>
    %149 = arith.divf %147, %148 : vector<8x128xf32>
    %150 = vector.extract_strided_slice %143 {offsets = [0, 128], sizes = [8, 128], strides = [1, 1]} : vector<8x512xf32> to vector<8x128xf32>
    %151 = arith.negf %150 : vector<8x128xf32>
    %152 = math.exp %151 : vector<8x128xf32>
    %cst_46 = arith.constant 1.000000e+00 : f32
    %153 = vector.broadcast %cst_46 : f32 to vector<8x128xf32>
    %154 = arith.addf %153, %152 : vector<8x128xf32>
    %155 = arith.divf %153, %154 : vector<8x128xf32>
    %156 = vector.extract_strided_slice %143 {offsets = [0, 256], sizes = [8, 128], strides = [1, 1]} : vector<8x512xf32> to vector<8x128xf32>
    %157 = math.tanh %156 : vector<8x128xf32>
    %158 = vector.extract_strided_slice %143 {offsets = [0, 384], sizes = [8, 128], strides = [1, 1]} : vector<8x512xf32> to vector<8x128xf32>
    %159 = arith.negf %158 : vector<8x128xf32>
    %160 = math.exp %159 : vector<8x128xf32>
    %cst_47 = arith.constant 1.000000e+00 : f32
    %161 = vector.broadcast %cst_47 : f32 to vector<8x128xf32>
    %162 = arith.addf %161, %160 : vector<8x128xf32>
    %163 = arith.divf %161, %162 : vector<8x128xf32>
    %164 = arith.mulf %155, %134 : vector<8x128xf32>
    %165 = arith.mulf %149, %157 : vector<8x128xf32>
    %166 = arith.addf %164, %165 : vector<8x128xf32>
    %167 = math.tanh %166 : vector<8x128xf32>
    %168 = arith.mulf %163, %167 : vector<8x128xf32>
    %c5_i32 = arith.constant 5 : i32
    %c8_i32_48 = arith.constant 8 : i32
    %169 = arith.muli %c5_i32, %c8_i32_48 : i32
    %170 = tpu.assume_multiple %169, 8 : i32
    %171 = arith.index_cast %170 : i32 to index
    %c0_49 = arith.constant 0 : index
    %172 = vector.load %arg8[%171, %c0_49] : memref<64x512xf32, #tpu.memory_space<vmem>>, vector<8x512xf32>
    %c0_50 = arith.constant 0 : index
    %c0_51 = arith.constant 0 : index
    %173 = vector.load %arg3[%c0_50, %c0_51] : memref<128x512xf32, #tpu.memory_space<vmem>>, vector<128x512xf32>
    %cst_52 = arith.constant dense<0.000000e+00> : vector<8x512xf32>
    %174 = tpu.matmul %168, %173, %cst_52 {dimension_numbers = #tpu.dot_dimension_numbers<[1], [0], [0], [1], [0, 0, 1, 1], [], []>} : vector<8x128xf32>, vector<128x512xf32>, vector<8x512xf32> -> vector<8x512xf32>
    %175 = arith.addf %172, %174 : vector<8x512xf32>
    %176 = vector.extract_strided_slice %175 {offsets = [0, 0], sizes = [8, 128], strides = [1, 1]} : vector<8x512xf32> to vector<8x128xf32>
    %177 = arith.negf %176 : vector<8x128xf32>
    %178 = math.exp %177 : vector<8x128xf32>
    %cst_53 = arith.constant 1.000000e+00 : f32
    %179 = vector.broadcast %cst_53 : f32 to vector<8x128xf32>
    %180 = arith.addf %179, %178 : vector<8x128xf32>
    %181 = arith.divf %179, %180 : vector<8x128xf32>
    %182 = vector.extract_strided_slice %175 {offsets = [0, 128], sizes = [8, 128], strides = [1, 1]} : vector<8x512xf32> to vector<8x128xf32>
    %183 = arith.negf %182 : vector<8x128xf32>
    %184 = math.exp %183 : vector<8x128xf32>
    %cst_54 = arith.constant 1.000000e+00 : f32
    %185 = vector.broadcast %cst_54 : f32 to vector<8x128xf32>
    %186 = arith.addf %185, %184 : vector<8x128xf32>
    %187 = arith.divf %185, %186 : vector<8x128xf32>
    %188 = vector.extract_strided_slice %175 {offsets = [0, 256], sizes = [8, 128], strides = [1, 1]} : vector<8x512xf32> to vector<8x128xf32>
    %189 = math.tanh %188 : vector<8x128xf32>
    %190 = vector.extract_strided_slice %175 {offsets = [0, 384], sizes = [8, 128], strides = [1, 1]} : vector<8x512xf32> to vector<8x128xf32>
    %191 = arith.negf %190 : vector<8x128xf32>
    %192 = math.exp %191 : vector<8x128xf32>
    %cst_55 = arith.constant 1.000000e+00 : f32
    %193 = vector.broadcast %cst_55 : f32 to vector<8x128xf32>
    %194 = arith.addf %193, %192 : vector<8x128xf32>
    %195 = arith.divf %193, %194 : vector<8x128xf32>
    %196 = arith.mulf %187, %166 : vector<8x128xf32>
    %197 = arith.mulf %181, %189 : vector<8x128xf32>
    %198 = arith.addf %196, %197 : vector<8x128xf32>
    %199 = math.tanh %198 : vector<8x128xf32>
    %200 = arith.mulf %195, %199 : vector<8x128xf32>
    %c6_i32 = arith.constant 6 : i32
    %c8_i32_56 = arith.constant 8 : i32
    %201 = arith.muli %c6_i32, %c8_i32_56 : i32
    %202 = tpu.assume_multiple %201, 8 : i32
    %203 = arith.index_cast %202 : i32 to index
    %c0_57 = arith.constant 0 : index
    %204 = vector.load %arg8[%203, %c0_57] : memref<64x512xf32, #tpu.memory_space<vmem>>, vector<8x512xf32>
    %c0_58 = arith.constant 0 : index
    %c0_59 = arith.constant 0 : index
    %205 = vector.load %arg3[%c0_58, %c0_59] : memref<128x512xf32, #tpu.memory_space<vmem>>, vector<128x512xf32>
    %cst_60 = arith.constant dense<0.000000e+00> : vector<8x512xf32>
    %206 = tpu.matmul %200, %205, %cst_60 {dimension_numbers = #tpu.dot_dimension_numbers<[1], [0], [0], [1], [0, 0, 1, 1], [], []>} : vector<8x128xf32>, vector<128x512xf32>, vector<8x512xf32> -> vector<8x512xf32>
    %207 = arith.addf %204, %206 : vector<8x512xf32>
    %208 = vector.extract_strided_slice %207 {offsets = [0, 0], sizes = [8, 128], strides = [1, 1]} : vector<8x512xf32> to vector<8x128xf32>
    %209 = arith.negf %208 : vector<8x128xf32>
    %210 = math.exp %209 : vector<8x128xf32>
    %cst_61 = arith.constant 1.000000e+00 : f32
    %211 = vector.broadcast %cst_61 : f32 to vector<8x128xf32>
    %212 = arith.addf %211, %210 : vector<8x128xf32>
    %213 = arith.divf %211, %212 : vector<8x128xf32>
    %214 = vector.extract_strided_slice %207 {offsets = [0, 128], sizes = [8, 128], strides = [1, 1]} : vector<8x512xf32> to vector<8x128xf32>
    %215 = arith.negf %214 : vector<8x128xf32>
    %216 = math.exp %215 : vector<8x128xf32>
    %cst_62 = arith.constant 1.000000e+00 : f32
    %217 = vector.broadcast %cst_62 : f32 to vector<8x128xf32>
    %218 = arith.addf %217, %216 : vector<8x128xf32>
    %219 = arith.divf %217, %218 : vector<8x128xf32>
    %220 = vector.extract_strided_slice %207 {offsets = [0, 256], sizes = [8, 128], strides = [1, 1]} : vector<8x512xf32> to vector<8x128xf32>
    %221 = math.tanh %220 : vector<8x128xf32>
    %222 = vector.extract_strided_slice %207 {offsets = [0, 384], sizes = [8, 128], strides = [1, 1]} : vector<8x512xf32> to vector<8x128xf32>
    %223 = arith.negf %222 : vector<8x128xf32>
    %224 = math.exp %223 : vector<8x128xf32>
    %cst_63 = arith.constant 1.000000e+00 : f32
    %225 = vector.broadcast %cst_63 : f32 to vector<8x128xf32>
    %226 = arith.addf %225, %224 : vector<8x128xf32>
    %227 = arith.divf %225, %226 : vector<8x128xf32>
    %228 = arith.mulf %219, %198 : vector<8x128xf32>
    %229 = arith.mulf %213, %221 : vector<8x128xf32>
    %230 = arith.addf %228, %229 : vector<8x128xf32>
    %231 = math.tanh %230 : vector<8x128xf32>
    %232 = arith.mulf %227, %231 : vector<8x128xf32>
    %c7_i32 = arith.constant 7 : i32
    %c8_i32_64 = arith.constant 8 : i32
    %233 = arith.muli %c7_i32, %c8_i32_64 : i32
    %234 = tpu.assume_multiple %233, 8 : i32
    %235 = arith.index_cast %234 : i32 to index
    %c0_65 = arith.constant 0 : index
    %236 = vector.load %arg8[%235, %c0_65] : memref<64x512xf32, #tpu.memory_space<vmem>>, vector<8x512xf32>
    %c0_66 = arith.constant 0 : index
    %c0_67 = arith.constant 0 : index
    %237 = vector.load %arg3[%c0_66, %c0_67] : memref<128x512xf32, #tpu.memory_space<vmem>>, vector<128x512xf32>
    %cst_68 = arith.constant dense<0.000000e+00> : vector<8x512xf32>
    %238 = tpu.matmul %232, %237, %cst_68 {dimension_numbers = #tpu.dot_dimension_numbers<[1], [0], [0], [1], [0, 0, 1, 1], [], []>} : vector<8x128xf32>, vector<128x512xf32>, vector<8x512xf32> -> vector<8x512xf32>
    %239 = arith.addf %236, %238 : vector<8x512xf32>
    %240 = vector.extract_strided_slice %239 {offsets = [0, 0], sizes = [8, 128], strides = [1, 1]} : vector<8x512xf32> to vector<8x128xf32>
    %241 = arith.negf %240 : vector<8x128xf32>
    %242 = math.exp %241 : vector<8x128xf32>
    %cst_69 = arith.constant 1.000000e+00 : f32
    %243 = vector.broadcast %cst_69 : f32 to vector<8x128xf32>
    %244 = arith.addf %243, %242 : vector<8x128xf32>
    %245 = arith.divf %243, %244 : vector<8x128xf32>
    %246 = vector.extract_strided_slice %239 {offsets = [0, 128], sizes = [8, 128], strides = [1, 1]} : vector<8x512xf32> to vector<8x128xf32>
    %247 = arith.negf %246 : vector<8x128xf32>
    %248 = math.exp %247 : vector<8x128xf32>
    %cst_70 = arith.constant 1.000000e+00 : f32
    %249 = vector.broadcast %cst_70 : f32 to vector<8x128xf32>
    %250 = arith.addf %249, %248 : vector<8x128xf32>
    %251 = arith.divf %249, %250 : vector<8x128xf32>
    %252 = vector.extract_strided_slice %239 {offsets = [0, 256], sizes = [8, 128], strides = [1, 1]} : vector<8x512xf32> to vector<8x128xf32>
    %253 = math.tanh %252 : vector<8x128xf32>
    %254 = vector.extract_strided_slice %239 {offsets = [0, 384], sizes = [8, 128], strides = [1, 1]} : vector<8x512xf32> to vector<8x128xf32>
    %255 = arith.negf %254 : vector<8x128xf32>
    %256 = math.exp %255 : vector<8x128xf32>
    %cst_71 = arith.constant 1.000000e+00 : f32
    %257 = vector.broadcast %cst_71 : f32 to vector<8x128xf32>
    %258 = arith.addf %257, %256 : vector<8x128xf32>
    %259 = arith.divf %257, %258 : vector<8x128xf32>
    %260 = arith.mulf %251, %230 : vector<8x128xf32>
    %261 = arith.mulf %245, %253 : vector<8x128xf32>
    %262 = arith.addf %260, %261 : vector<8x128xf32>
    %263 = math.tanh %262 : vector<8x128xf32>
    %264 = arith.mulf %259, %263 : vector<8x128xf32>
    %c8_i32_72 = arith.constant 8 : i32
    %c0_73 = arith.constant 0 : index
    %c0_74 = arith.constant 0 : index
    %265 = vector.load %arg5[%c0_73, %c0_74] : memref<128x128xf32, #tpu.memory_space<vmem>>, vector<128x128xf32>
    %cst_75 = arith.constant dense<0.000000e+00> : vector<8x128xf32>
    %266 = tpu.matmul %264, %265, %cst_75 {dimension_numbers = #tpu.dot_dimension_numbers<[1], [0], [0], [1], [0, 0, 1, 1], [], []>} : vector<8x128xf32>, vector<128x128xf32>, vector<8x128xf32> -> vector<8x128xf32>
    %c0_76 = arith.constant 0 : index
    %c0_77 = arith.constant 0 : index
    %267 = vector.load %arg6[%c0_76, %c0_77] : memref<1x128xf32, #tpu.memory_space<vmem>>, vector<1x128xf32>
    %268 = vector.broadcast %267 : vector<1x128xf32> to vector<8x128xf32>
    %269 = arith.addf %266, %268 : vector<8x128xf32>
    %cst_78 = arith.constant dense<0xFF800000> : vector<8xf32>
    %270 = vector.multi_reduction <maximumf>, %269, %cst_78 [1] : vector<8x128xf32> to vector<8xf32>
    %271 = vector.shape_cast %270 : vector<8xf32> to vector<8x1xf32>
    %272 = vector.broadcast %271 : vector<8x1xf32> to vector<8x128xf32>
    %273 = arith.subf %269, %272 : vector<8x128xf32>
    %274 = math.exp %273 : vector<8x128xf32>
    %cst_79 = arith.constant dense<0.000000e+00> : vector<8xf32>
    %275 = vector.multi_reduction <add>, %274, %cst_79 [1] : vector<8x128xf32> to vector<8xf32>
    %276 = vector.shape_cast %275 : vector<8xf32> to vector<8x1xf32>
    %277 = math.log %276 : vector<8x1xf32>
    %278 = arith.addf %277, %271 : vector<8x1xf32>
    %279 = vector.broadcast %278 : vector<8x1xf32> to vector<8x128xf32>
    %280 = arith.subf %269, %279 : vector<8x128xf32>
    %c0_80 = arith.constant 0 : index
    %c0_81 = arith.constant 0 : index
    %281 = vector.load %arg7[%c0_80, %c0_81] : memref<8x128xf32, #tpu.memory_space<vmem>>, vector<8x128xf32>
    tpu.vector_store %arg7[%c0_80, %c0_81], %280 {strides = array<i32>} : memref<8x128xf32, #tpu.memory_space<vmem>>, vector<8x128xf32>,
    return
  }
  func.func @transform_0(%arg0: i32) -> (i32, i32) {
    %c0_i32 = arith.constant 0 : i32
    %c0_i32_0 = arith.constant 0 : i32
    %c0_i32_1 = arith.constant 0 : i32
    return %c0_i32, %c0_i32_0 : i32, i32
  }
  func.func @transform_1(%arg0: i32) -> (i32, i32) {
    %c0_i32 = arith.constant 0 : i32
    %c0_i32_0 = arith.constant 0 : i32
    %c0_i32_1 = arith.constant 0 : i32
    return %c0_i32, %c0_i32_0 : i32, i32
  }
  func.func @transform_2(%arg0: i32) -> (i32, i32) {
    %c0_i32 = arith.constant 0 : i32
    %c0_i32_0 = arith.constant 0 : i32
    %c0_i32_1 = arith.constant 0 : i32
    return %c0_i32, %c0_i32_0 : i32, i32
  }
  func.func @transform_3(%arg0: i32) -> (i32, i32) {
    %c0_i32 = arith.constant 0 : i32
    %c0_i32_0 = arith.constant 0 : i32
    %c0_i32_1 = arith.constant 0 : i32
    return %c0_i32, %c0_i32_0 : i32, i32
  }
  func.func @transform_4(%arg0: i32) -> (i32, i32) {
    %c0_i32 = arith.constant 0 : i32
    %c0_i32_0 = arith.constant 0 : i32
    %c0_i32_1 = arith.constant 0 : i32
    return %c0_i32, %c0_i32_0 : i32, i32
  }
  func.func @transform_5(%arg0: i32) -> (i32, i32) {
    %c0_i32 = arith.constant 0 : i32
    %c0_i32_0 = arith.constant 0 : i32
    %c0_i32_1 = arith.constant 0 : i32
    return %c0_i32, %c0_i32_0 : i32, i32
  }
  func.func @transform_6(%arg0: i32) -> (i32, i32) {
    %c0_i32 = arith.constant 0 : i32
    %c0_i32_0 = arith.constant 0 : i32
    %c0_i32_1 = arith.constant 0 : i32
    return %c0_i32, %c0_i32_0 : i32, i32
  }
}

</mosaic_0001>

<bundles_post_ra>
// kernel: lstm_forward.1
= control target key start
LH: loop header
LB: loop body
LE: loop exit
PB: predicated region body
PF: predicated region fallthrough
CT: control target
= control target key end

     0   :  { %vm58_vm0 = vcmask 261120   ;;  %s3443_s0 = inlined_call_operand.vmem [shape: f32[64,32], index: 0, kind: input, shape index: {}]   ;;  %s3444_s1 = inlined_call_operand.vmem [shape: f32[32,512], index: 1, kind: input, shape index: {}]   ;;  %s3445_s2 = inlined_call_operand.vmem [shape: f32[128,512], index: 2, kind: input, shape index: {}]   ;;  %s3446_s3 = inlined_call_operand.vmem [shape: f32[1,512], index: 3, kind: input, shape index: {}]   ;;  %s3447_s4 = inlined_call_operand.vmem [shape: f32[128,128], index: 4, kind: input, shape index: {}]   ;;  %s3448_s5 = inlined_call_operand.vmem [shape: f32[1,128], index: 5, kind: input, shape index: {}]   ;;  %s3449_s6 = inlined_call_operand.hbm [shape: f32[8,128], index: 6, kind: output, shape index: {}]  }
   0x1   :  { %v44_v0 = vld [vmem:[%s3444_s1 + $0x60] sm:$0xff]  ;;  %v1998_v5 = vld [vmem:[%s3443_s0 + $0x28] sm:$0xff]  ;;  %v2003_v6 = vld [vmem:[%s3443_s0 + $0x30] sm:$0xff] }
   0x2   :  { %v40_v1 = vld [vmem:[%s3444_s1 + $0x40] sm:$0xff]  ;;  %95 = vmatpush.msra.mxu0 %v44_v0  ;;  %1706 = vmatpush.msra.mxu1 %v44_v0  ;;  %v2008_v7 = vld [vmem:[%s3443_s0 + $0x38] sm:$0xff]  ;;  %v45_v8 = vld [vmem:[%s3444_s1 + $0x68] sm:$0xff] }
   0x3   :  { %1707 = vmatpush.msra.mxu2 %v44_v0  ;;  %1708 = vmatpush.msra.mxu3 %v44_v0  ;;  %v36_v2 = vld [vmem:[%s3444_s1 + $0x20] sm:$0xff]  ;;  %v46_v9 = vld [vmem:[%s3444_s1 + $0x70] sm:$0xff]  ;;  %v47_v10 = vld [vmem:[%s3444_s1 + $0x78] sm:$0xff] }
   0x4   :  { %96 = vmatpush.msra.mxu0 %v40_v1  ;;  %1709 = vmatpush.msra.mxu1 %v40_v1  ;;  %v32_v3 = vld [vmem:[%s3444_s1] sm:$0xff]  ;;  %v41_v12 = vld [vmem:[%s3444_s1 + $0x48] sm:$0xff]  ;;  %v42_v13 = vld [vmem:[%s3444_s1 + $0x50] sm:$0xff] }
   0x5   :  { %1710 = vmatpush.msra.mxu2 %v40_v1  ;;  %1711 = vmatpush.msra.mxu3 %v40_v1  ;;  %v24_v4 = vld [vmem:[%s3443_s0] sm:$0xff]  ;;  %v43_v14 = vld [vmem:[%s3444_s1 + $0x58] sm:$0xff]  ;;  %v37_v16 = vld [vmem:[%s3444_s1 + $0x28] sm:$0xff] }
   0x6   :  { %97 = vmatpush.msra.mxu0 %v36_v2  ;;  %1712 = vmatpush.msra.mxu1 %v36_v2  ;;  %v2025_v11 = vld [vmem:[%s3445_s2 + $0x1e0] sm:$0xff]  ;;  %v38_v17 = vld [vmem:[%s3444_s1 + $0x30] sm:$0xff]  ;;  %v39_v18 = vld [vmem:[%s3444_s1 + $0x38] sm:$0xff] }
   0x7   :  { %1713 = vmatpush.msra.mxu2 %v36_v2  ;;  %1714 = vmatpush.msra.mxu3 %v36_v2  ;;  %3550 = vst [vmem:[#allocation6_spill] sm:$0xff] %v2025_v11  ;;  %v2043_v15 = vld [vmem:[%s3445_s2 + $0x1c0] sm:$0xff]  ;;  %v33_v20 = vld [vmem:[%s3444_s1 + $0x8] sm:$0xff]  ;;  %v34_v21 = vld [vmem:[%s3444_s1 + $0x10] sm:$0xff] }
   0x8   :  { %98 = vmatpush.msra.mxu0 %v32_v3  ;;  %1715 = vmatpush.msra.mxu1 %v32_v3  ;;  %3551 = vst [vmem:[#allocation7_spill] sm:$0xff] %v2043_v15  ;;  %v2058_v19 = vld [vmem:[%s3445_s2 + $0x1a0] sm:$0xff]  ;;  %v35_v22 = vld [vmem:[%s3444_s1 + $0x18] sm:$0xff]  ;;  %v25_v23 = vld [vmem:[%s3443_s0 + $0x8] sm:$0xff] }
   0x9   :  { %1716 = vmatpush.msra.mxu2 %v32_v3  ;;  %1717 = vmatpush.msra.mxu3 %v32_v3  ;;  %v2077_v24 = vld [vmem:[%s3445_s2 + $0x1e8] sm:$0xff]  ;;  %v2083_v25 = vld [vmem:[%s3445_s2 + $0x1f8] sm:$0xff]  ;;  %v2088_v26 = vld [vmem:[%s3445_s2 + $0x180] sm:$0xff] }
   0xa   :  { %1650 = vmatmul.msk.f32.vlgmr.msra.gmra.mxu0 %vm58_vm0, %v24_v4  ;;  %1655 = vmatmul.msk.f32.vlgmr.msra.gmra.mxu1 %vm58_vm0, %v1998_v5  ;;  %v2095_v27 = vld [vmem:[%s3445_s2 + $0x1c8] sm:$0xff]  ;;  %v2100_v28 = vld [vmem:[%s3445_s2 + $0x1f0] sm:$0xff]  ;;  %v2107_v29 = vld [vmem:[%s3445_s2 + $0x160] sm:$0xff] }
   0xb   :  { %1656 = vmatmul.msk.f32.vlgmr.msra.gmra.mxu2 %vm58_vm0, %v2003_v6  ;;  %1657 = vmatmul.msk.f32.vlgmr.msra.gmra.mxu3 %vm58_vm0, %v2008_v7  ;;  %v2112_v30 = vld [vmem:[%s3445_s2 + $0x1d8] sm:$0xff]  ;;  %v2119_v31 = vld [vmem:[%s3445_s2 + $0x1a8] sm:$0xff]  ;;  %v2124_v32 = vld [vmem:[%s3445_s2 + $0x140] sm:$0xff] }
   0xc   :  { %136 = vmatpush.msrb.mxu1 %v45_v8  ;;  %177 = vmatpush.msrb.mxu2 %v46_v9  ;;  %v2129_v33 = vld [vmem:[%s3445_s2 + $0x1d0] sm:$0xff]  ;;  %v2135_v34 = vld [vmem:[%s3445_s2 + $0x1b8] sm:$0xff] }
   0xd   :  { %218 = vmatpush.msrb.mxu3 %v47_v10  ;;  %350 = vmatpush.msrb.mxu0 %v2025_v11 }
   0xe   :  { %137 = vmatpush.msrb.mxu1 %v41_v12  ;;  %178 = vmatpush.msrb.mxu2 %v42_v13 }
   0xf   :  { %219 = vmatpush.msrb.mxu3 %v43_v14  ;;  %351 = vmatpush.msrb.mxu0 %v2043_v15 }
  0x10   :  { %138 = vmatpush.msrb.mxu1 %v37_v16  ;;  %179 = vmatpush.msrb.mxu2 %v38_v17 }
  0x11   :  { %220 = vmatpush.msrb.mxu3 %v39_v18  ;;  %352 = vmatpush.msrb.mxu0 %v2058_v19 }
  0x12   :  { %139 = vmatpush.msrb.mxu1 %v33_v20  ;;  %180 = vmatpush.msrb.mxu2 %v34_v21 }
  0x13   :  { %221 = vmatpush.msrb.mxu3 %v35_v22  ;;  %1651 = vmatmul.msk.f32.gmra.mxu0 %vm58_vm0, %v25_v23 }
  0x14   :  { %1658 = vmatmul.msk.f32.vlgmr.msrb.gmra.mxu1 %vm58_vm0, %v24_v4  ;;  %1666 = vmatmul.msk.f32.vlgmr.msrb.gmra.mxu2 %vm58_vm0, %v24_v4 }
  0x15   :  { %1674 = vmatmul.msk.f32.vlgmr.msrb.gmra.mxu3 %vm58_vm0, %v24_v4  ;;  %370 = vmatpush.msra.mxu1 %v2077_v24 }
  0x16   :  { %410 = vmatpush.msra.mxu3 %v2083_v25  ;;  %353 = vmatpush.msrb.mxu0 %v2088_v26 }
  0x17   :  { %371 = vmatpush.msra.mxu1 %v2095_v27  ;;  %390 = vmatpush.msra.mxu2 %v2100_v28 }
  0x18   :  { %11 = vsyncpa [#allocation4], 0  ;;  %v26_v35 = vld [vmem:[%s3443_s0 + $0x10] sm:$0xff]  ;;  %354 = vmatpush.msrb.mxu0 %v2107_v29  ;;  %411 = vmatpush.msra.mxu3 %v2112_v30  ;;  %v2146_v36 = vld [vmem:[%s3445_s2 + $0x188] sm:$0xff]  ;;  %v3450_v21 = vmov 0.0   ;;  %s1944_s21 = smov [#allocation3]  }
  0x19   :  { %372 = vmatpush.msra.mxu1 %v2119_v31  ;;  %391 = vmatpush.msra.mxu2 %v2129_v33  ;;  %v2154_v37 = vld [vmem:[%s3445_s2 + $0x120] sm:$0xff]  ;;  %v2162_v38 = vld [vmem:[%s3445_s2 + $0x168] sm:$0xff]  ;;  %v2167_v39 = vld [vmem:[%s3445_s2 + $0x198] sm:$0xff]  ;;  %s1632_s22 = sshll.u32 %s1944_s21, 4  ;;  %s1634_s24 = sshll.u32 %s3449_s6, 4  ;;  %s1633_s22 = int_to_ptr.vmem [resolvable:$true] %s1632_s22  ;;  %s1635_s24 = int_to_ptr.hbm [resolvable:$true] %s1634_s24 }
  0x1a   :  { %355 = vmatpush.msrb.mxu0 %v2124_v32  ;;  %412 = vmatpush.msra.mxu3 %v2135_v34  ;;  %v2174_v40 = vld [vmem:[%s3445_s2 + $0x100] sm:$0xff]  ;;  %v2179_v41 = vld [vmem:[%s3445_s2 + $0x1b0] sm:$0xff]  ;;  %v2186_v42 = vld [vmem:[%s3445_s2 + $0x148] sm:$0xff] }
  0x1b   :  { %1652 = vmatmul.msk.f32.gmra.mxu0 %vm58_vm0, %v26_v35  ;;  %373 = vmatpush.msra.mxu1 %v2146_v36  ;;  %v2191_v43 = vld [vmem:[%s3445_s2 + $0x178] sm:$0xff]  ;;  %v2197_v44 = vld [vmem:[%s3445_s2 + $0xe0] sm:$0xff]  ;;  %v2203_v45 = vld [vmem:[%s3445_s2 + $0x190] sm:$0xff] }
  0x1c   :  { %1659 = vmatmul.msk.f32.gmra.mxu1 %vm58_vm0, %v25_v23  ;;  %1667 = vmatmul.msk.f32.gmra.mxu2 %vm58_vm0, %v25_v23  ;;  %v2210_v46 = vld [vmem:[%s3445_s2 + $0x128] sm:$0xff]  ;;  %v2215_v47 = vld [vmem:[%s3445_s2 + $0x158] sm:$0xff]  ;;  %v2225_v49 = vld [vmem:[%s3445_s2 + $0x170] sm:$0xff] }
  0x1d   :  { %1675 = vmatmul.msk.f32.gmra.mxu3 %vm58_vm0, %v25_v23  ;;  %356 = vmatpush.msrb.mxu0 %v2154_v37  ;;  %v27_v48 = vld [vmem:[%s3443_s0 + $0x18] sm:$0xff]  ;;  %v2232_v50 = vld [vmem:[%s3445_s2 + $0xc0] sm:$0xff]  ;;  %v2240_v51 = vld [vmem:[%s3445_s2 + $0x108] sm:$0xff] }
  0x1e   :  { %374 = vmatpush.msra.mxu1 %v2162_v38  ;;  %413 = vmatpush.msra.mxu3 %v2167_v39  ;;  %v2245_v52 = vld [vmem:[%s3445_s2 + $0x138] sm:$0xff]  ;;  %v2253_v53 = vld [vmem:[%s3445_s2 + $0xa0] sm:$0xff]  ;;  %v2258_v54 = vld [vmem:[%s3445_s2 + $0x150] sm:$0xff] }
  0x1f   :  { %357 = vmatpush.msrb.mxu0 %v2174_v40  ;;  %392 = vmatpush.msra.mxu2 %v2179_v41  ;;  %3552 = vst [vmem:[#allocation8_spill] sm:$0xff] %v2253_v53  ;;  %v2265_v55 = vld [vmem:[%s3445_s2 + $0xe8] sm:$0xff]  ;;  %v2270_v56 = vld [vmem:[%s3445_s2 + $0x118] sm:$0xff]  ;;  %v2275_v57 = vld [vmem:[%s3445_s2 + $0x80] sm:$0xff] }
  0x20   :  { %375 = vmatpush.msra.mxu1 %v2186_v42  ;;  %414 = vmatpush.msra.mxu3 %v2191_v43  ;;  %3553 = vst [vmem:[#allocation9_spill] sm:$0xff] %v2275_v57  ;;  %v2282_v58 = vld [vmem:[%s3445_s2 + $0x130] sm:$0xff]  ;;  %v2289_v59 = vld [vmem:[%s3445_s2 + $0xc8] sm:$0xff]  ;;  %v2294_v60 = vld [vmem:[%s3445_s2 + $0xf8] sm:$0xff] }
  0x21   :  { %358 = vmatpush.msrb.mxu0 %v2197_v44  ;;  %393 = vmatpush.msra.mxu2 %v2203_v45  ;;  %v28_v61 = vld [vmem:[%s3443_s0 + $0x20] sm:$0xff]  ;;  %v2304_v62 = vld [vmem:[%s3445_s2 + $0x110] sm:$0xff]  ;;  %v2319_v0 = vld [vmem:[%s3445_s2 + $0xa8] sm:$0xff] }
  0x22   :  { %376 = vmatpush.msra.mxu1 %v2210_v46  ;;  %415 = vmatpush.msra.mxu3 %v2215_v47  ;;  %v2311_v63 = vld [vmem:[%s3445_s2 + $0x60] sm:$0xff]  ;;  %3555 = vst [vmem:[#allocation11_spill] sm:$0xff] %v2319_v0  ;;  %v2324_v1 = vld [vmem:[%s3445_s2 + $0xd8] sm:$0xff]  ;;  %v2337_v3 = vld [vmem:[%s3445_s2 + $0xf0] sm:$0xff] }
  0x23   :  { %1653 = vmatmul.msk.f32.gmra.mxu0 %vm58_vm0, %v27_v48  ;;  %394 = vmatpush.msra.mxu2 %v2225_v49  ;;  %3554 = vst [vmem:[#allocation10_spill] sm:$0xff] %v2311_v63  ;;  %v2332_v2 = vld [vmem:[%s3445_s2 + $0x40] sm:$0xff]  ;;  %v2344_v4 = vld [vmem:[%s3445_s2 + $0x88] sm:$0xff]  ;;  %v2349_v8 = vld [vmem:[%s3445_s2 + $0xb8] sm:$0xff] }
  0x24   :  { %1660 = vmatmul.msk.f32.gmra.mxu1 %vm58_vm0, %v26_v35  ;;  %1668 = vmatmul.msk.f32.gmra.mxu2 %vm58_vm0, %v26_v35  ;;  %3556 = vst [vmem:[#allocation12_spill] sm:$0xff] %v2324_v1  ;;  %v2354_v9 = vld [vmem:[%s3445_s2 + $0x20] sm:$0xff]  ;;  %v2361_v10 = vld [vmem:[%s3445_s2 + $0xd0] sm:$0xff]  ;;  %v2368_v12 = vld [vmem:[%s3445_s2 + $0x68] sm:$0xff] }
  0x25   :  { %1676 = vmatmul.msk.f32.gmra.mxu3 %vm58_vm0, %v26_v35  ;;  %359 = vmatpush.msrb.mxu0 %v2232_v50  ;;  %3557 = vst [vmem:[#allocation13_spill] sm:$0xff] %v2332_v2  ;;  %v2373_v13 = vld [vmem:[%s3445_s2 + $0x98] sm:$0xff]  ;;  %v2378_v14 = vld [vmem:[%s3445_s2] sm:$0xff]  ;;  %v2385_v16 = vld [vmem:[%s3445_s2 + $0xb0] sm:$0xff] }
  0x26   :  { %377 = vmatpush.msra.mxu1 %v2240_v51  ;;  %416 = vmatpush.msra.mxu3 %v2245_v52  ;;  %3558 = vst [vmem:[#allocation14_spill] sm:$0xff] %v2344_v4  ;;  %v2395_v17 = vld [vmem:[%s3445_s2 + $0x48] sm:$0xff]  ;;  %v2401_v18 = vld [vmem:[%s3445_s2 + $0x78] sm:$0xff]  ;;  %v2408_v20 = vld [vmem:[%s3445_s2 + $0x90] sm:$0xff] }
  0x27   :  { %360 = vmatpush.msrb.mxu0 %v2253_v53  ;;  %395 = vmatpush.msra.mxu2 %v2258_v54  ;;  %3559 = vst [vmem:[#allocation15_spill] sm:$0xff] %v2349_v8  ;;  %v2415_v22 = vld [vmem:[%s3445_s2 + $0x28] sm:$0xff]  ;;  %v2420_v23 = vld [vmem:[%s3445_s2 + $0x58] sm:$0xff]  ;;  %v2427_v35 = vld [vmem:[%s3445_s2 + $0x70] sm:$0xff] }
  0x28   :  { %378 = vmatpush.msra.mxu1 %v2265_v55  ;;  %417 = vmatpush.msra.mxu3 %v2270_v56  ;;  %3560 = vst [vmem:[#allocation16_spill] sm:$0xff] %v2354_v9 }
  0x29   :  { %361 = vmatpush.msrb.mxu0 %v2275_v57  ;;  %396 = vmatpush.msra.mxu2 %v2282_v58  ;;  %3561 = vst [vmem:[#allocation17_spill] sm:$0xff] %v2361_v10 }
  0x2a   :  { %379 = vmatpush.msra.mxu1 %v2289_v59  ;;  %418 = vmatpush.msra.mxu3 %v2294_v60  ;;  %3562 = vst [vmem:[#allocation18_spill] sm:$0xff] %v2368_v12 }
  0x2b   :  { %1654 = vmatmul.msk.f32.gmra.mxu0 %vm58_vm0, %v28_v61  ;;  %397 = vmatpush.msra.mxu2 %v2304_v62  ;;  %3563 = vst [vmem:[#allocation19_spill] sm:$0xff] %v2373_v13 }
  0x2c   :  { %1661 = vmatmul.msk.f32.gmra.mxu1 %vm58_vm0, %v27_v48  ;;  %1669 = vmatmul.msk.f32.gmra.mxu2 %vm58_vm0, %v27_v48  ;;  %3564 = vst [vmem:[#allocation20_spill] sm:$0xff] %v2378_v14 }
  0x2d   :  { %1677 = vmatmul.msk.f32.gmra.mxu3 %vm58_vm0, %v27_v48  ;;  %362 = vmatpush.msrb.mxu0 %v2311_v63  ;;  %3565 = vst [vmem:[#allocation21_spill] sm:$0xff] %v2385_v16  ;;  %v2433_v48 = vld [vmem:[%s3445_s2 + $0x8] sm:$0xff] }
  0x2e   :  { %380 = vmatpush.msra.mxu1 %v2319_v0  ;;  %419 = vmatpush.msra.mxu3 %v2324_v1  ;;  %3566 = vst [vmem:[#allocation22_spill] sm:$0xff] %v2395_v17 }
  0x2f   :  { %363 = vmatpush.msrb.mxu0 %v2332_v2  ;;  %398 = vmatpush.msra.mxu2 %v2337_v3  ;;  %3567 = vst [vmem:[#allocation23_spill] sm:$0xff] %v2401_v18 }
  0x30   :  { %381 = vmatpush.msra.mxu1 %v2344_v4  ;;  %420 = vmatpush.msra.mxu3 %v2349_v8  ;;  %3568 = vst [vmem:[#allocation24_spill] sm:$0xff] %v2408_v20 }
  0x31   :  { %364 = vmatpush.msrb.mxu0 %v2354_v9  ;;  %399 = vmatpush.msra.mxu2 %v2361_v10  ;;  %3569 = vst [vmem:[#allocation25_spill] sm:$0xff] %v2415_v22 }
  0x32   :  { %382 = vmatpush.msra.mxu1 %v2368_v12  ;;  %421 = vmatpush.msra.mxu3 %v2373_v13  ;;  %3570 = vst [vmem:[#allocation26_spill] sm:$0xff] %v2420_v23 }
  0x33   :  { %365 = vmatpush.msrb.mxu0 %v2378_v14  ;;  %400 = vmatpush.msra.mxu2 %v2385_v16  ;;  %3571 = vst [vmem:[#allocation27_spill] sm:$0xff] %v2427_v35  ;;  %v2454_v14 = vld [vmem:[%s3445_s2 + $0x30] sm:$0xff] }
  0x34   :  { %1662 = vmatmul.msk.f32.gmra.mxu1 %vm58_vm0, %v28_v61  ;;  %1670 = vmatmul.msk.f32.gmra.mxu2 %vm58_vm0, %v28_v61  ;;  %3572 = vst [vmem:[#allocation28_spill] sm:$0xff] %v2433_v48 }
  0x35   :  { %1678 = vmatmul.msk.f32.gmra.mxu3 %vm58_vm0, %v28_v61  ;;  %366 = vmatmul.f32.vlgmr.msrb.gmra.mxu0 %v3450_v21  ;;  %v2438_v61 = vld [vmem:[%s3445_s2 + $0x38] sm:$0xff]  ;;  %v2446_v21 = vld [vmem:[%s3445_s2 + $0x50] sm:$0xff]  ;;  %3575 = vst [vmem:[#allocation31_spill] sm:$0xff] %v2454_v14 }
  0x36   :  { %383 = vmatpush.msra.mxu1 %v2395_v17  ;;  %422 = vmatpush.msra.mxu3 %v2401_v18  ;;  %3573 = vst [vmem:[#allocation29_spill] sm:$0xff] %v2438_v61 }
  0x37   :  { %401 = vmatpush.msra.mxu2 %v2408_v20  ;;  %504 = vmatpush.msra.mxu0 %v2025_v11  ;;  %3574 = vst [vmem:[#allocation30_spill] sm:$0xff] %v2446_v21  ;;  %v2461_v11 = vld [vmem:[%s3445_s2 + $0x18] sm:$0xff] }
  0x38   :  { %384 = vmatpush.msra.mxu1 %v2415_v22  ;;  %423 = vmatpush.msra.mxu3 %v2420_v23  ;;  %3576 = vst [vmem:[#allocation32_spill] sm:$0xff] %v2461_v11 }
  0x39   :  { %402 = vmatpush.msra.mxu2 %v2427_v35  ;;  %505 = vmatpush.msra.mxu0 %v2043_v15  ;;  %v2471_v15 = vld [vmem:[%s3445_s2 + $0x10] sm:$0xff] }
  0x3a   :  { %385 = vmatpush.msra.mxu1 %v2433_v48  ;;  %424 = vmatpush.msra.mxu3 %v2438_v61  ;;  %3577 = vst [vmem:[#allocation33_spill] sm:$0xff] %v2471_v15 }
  0x3b   :  { %403 = vmatpush.msra.mxu2 %v2446_v21  ;;  %506 = vmatpush.msra.mxu0 %v2058_v19 }
  0x3c   :  { %524 = vmatpush.msrb.mxu1 %v2077_v24  ;;  %1671 = vmatmul.msk.f32.gmra.mxu2 %vm58_vm0, %v1998_v5 }
  0x3d   :  { %1663 = vmatmul.msk.f32.gmra.mxu1 %vm58_vm0, %v1998_v5  ;;  %1679 = vmatmul.msk.f32.gmra.mxu3 %vm58_vm0, %v1998_v5  ;;  %v3578_v5 = vmov 0.0  }
  0x3e   :  { %404 = vmatpush.msra.mxu2 %v2454_v14  ;;  %425 = vmatpush.msra.mxu3 %v2461_v11 }
  0x3f   :  { %525 = vmatpush.msrb.mxu1 %v2095_v27  ;;  %507 = vmatpush.msra.mxu0 %v2088_v26 }
  0x40   :  { %405 = vmatpush.msra.mxu2 %v2471_v15  ;;  %564 = vmatpush.msrb.mxu3 %v2083_v25 }
  0x41   :  { %526 = vmatpush.msrb.mxu1 %v2119_v31  ;;  %508 = vmatpush.msra.mxu0 %v2107_v29 }
  0x42   :  { %544 = vmatpush.msrb.mxu2 %v2100_v28  ;;  %565 = vmatpush.msrb.mxu3 %v2112_v30 }
  0x43   :  { %527 = vmatpush.msrb.mxu1 %v2146_v36  ;;  %509 = vmatpush.msra.mxu0 %v2124_v32 }
  0x44   :  { %545 = vmatpush.msrb.mxu2 %v2129_v33  ;;  %566 = vmatpush.msrb.mxu3 %v2135_v34 }
  0x45   :  { %1664 = vmatmul.msk.f32.gmra.mxu1 %vm58_vm0, %v2003_v6  ;;  %1672 = vmatmul.msk.f32.gmra.mxu2 %vm58_vm0, %v2003_v6 }
  0x46   :  { %1680 = vmatmul.msk.f32.gmra.mxu3 %vm58_vm0, %v2003_v6  ;;  %546 = vmatpush.msrb.mxu2 %v2179_v41  ;;  %v3579_v6 = vld [vmem:[#allocation20_spill] sm:$0xff] }
  0x47   :  { %567 = vmatpush.msrb.mxu3 %v2167_v39  ;;  %528 = vmatpush.msrb.mxu1 %v2162_v38 }
  0x48   :  { %547 = vmatpush.msrb.mxu2 %v2203_v45  ;;  %510 = vmatpush.msra.mxu0 %v2154_v37 }
  0x49   :  { %568 = vmatpush.msrb.mxu3 %v2191_v43  ;;  %529 = vmatpush.msrb.mxu1 %v2186_v42 }
  0x4a   :  { %548 = vmatpush.msrb.mxu2 %v2225_v49  ;;  %511 = vmatpush.msra.mxu0 %v2174_v40 }
  0x4b   :  { %569 = vmatpush.msrb.mxu3 %v2215_v47  ;;  %530 = vmatpush.msrb.mxu1 %v2210_v46 }
  0x4c   :  { %549 = vmatpush.msrb.mxu2 %v2258_v54  ;;  %512 = vmatpush.msra.mxu0 %v2197_v44 }
  0x4d   :  { %1665 = vmatmul.msk.f32.gmra.mxu1 %vm58_vm0, %v2008_v7  ;;  %1673 = vmatmul.msk.f32.gmra.mxu2 %vm58_vm0, %v2008_v7 }
  0x4e   :  { %1681 = vmatmul.msk.f32.gmra.mxu3 %vm58_vm0, %v2008_v7  ;;  %550 = vmatpush.msrb.mxu2 %v2282_v58  ;;  %v3580_v7 = vld [vmem:[#allocation6_spill] sm:$0xff] }
  0x4f   :  { %570 = vmatpush.msrb.mxu3 %v2245_v52  ;;  %531 = vmatpush.msrb.mxu1 %v2240_v51 }
  0x50   :  { %551 = vmatpush.msrb.mxu2 %v2304_v62  ;;  %513 = vmatpush.msra.mxu0 %v2232_v50 }
  0x51   :  { %571 = vmatpush.msrb.mxu3 %v2270_v56  ;;  %532 = vmatpush.msrb.mxu1 %v2265_v55 }
  0x52   :  { %552 = vmatpush.msrb.mxu2 %v2337_v3  ;;  %514 = vmatpush.msra.mxu0 %v2253_v53 }
  0x53   :  { %572 = vmatpush.msrb.mxu3 %v2294_v60  ;;  %533 = vmatpush.msrb.mxu1 %v2289_v59 }
  0x54   :  { %553 = vmatpush.msrb.mxu2 %v2361_v10  ;;  %515 = vmatpush.msra.mxu0 %v2275_v57 }
  0x55   :  { %386 = vmatmul.f32.vlgmr.msra.gmra.mxu1 %v3578_v5  ;;  %406 = vmatmul.f32.vlgmr.msra.gmra.mxu2 %v3578_v5 }
  0x56   :  { %426 = vmatmul.f32.vlgmr.msra.gmra.mxu3 %v3578_v5  ;;  %534 = vmatpush.msrb.mxu1 %v2319_v0  ;;  %v3581_v5 = vld [vmem:[#allocation7_spill] sm:$0xff] }
  0x57   :  { %573 = vmatpush.msrb.mxu3 %v2324_v1  ;;  %554 = vmatpush.msrb.mxu2 %v2385_v16 }
  0x58   :  { %535 = vmatpush.msrb.mxu1 %v2344_v4  ;;  %516 = vmatpush.msra.mxu0 %v2311_v63 }
  0x59   :  { %574 = vmatpush.msrb.mxu3 %v2349_v8  ;;  %555 = vmatpush.msrb.mxu2 %v2408_v20 }
  0x5a   :  { %536 = vmatpush.msrb.mxu1 %v2368_v12  ;;  %517 = vmatpush.msra.mxu0 %v2332_v2 }
  0x5b   :  { %575 = vmatpush.msrb.mxu3 %v2373_v13  ;;  %556 = vmatpush.msrb.mxu2 %v2427_v35 }
  0x5c   :  { %537 = vmatpush.msrb.mxu1 %v2395_v17  ;;  %518 = vmatpush.msra.mxu0 %v2354_v9 }
  0x5d   :  { %576 = vmatpush.msrb.mxu3 %v2401_v18  ;;  %557 = vmatpush.msrb.mxu2 %v2446_v21 }
  0x5e   :  { %538 = vmatpush.msrb.mxu1 %v2415_v22  ;;  %519 = vmatpush.msra.mxu0 %v3579_v6 }
  0x5f   :  { %577 = vmatpush.msrb.mxu3 %v2420_v23  ;;  %558 = vmatpush.msrb.mxu2 %v2454_v14 }
  0x60   :  { %539 = vmatpush.msrb.mxu1 %v2433_v48  ;;  %658 = vmatpush.msrb.mxu0 %v3580_v7 }
  0x61   :  { %578 = vmatpush.msrb.mxu3 %v2438_v61  ;;  %559 = vmatpush.msrb.mxu2 %v2471_v15 }
  0x62   :  { %678 = vmatpush.msra.mxu1 %v2077_v24  ;;  %659 = vmatpush.msrb.mxu0 %v3581_v5 }
  0x63   :  { %579 = vmatpush.msrb.mxu3 %v2461_v11  ;;  %698 = vmatpush.msra.mxu2 %v2100_v28 }
  0x64   :  { %679 = vmatpush.msra.mxu1 %v2095_v27  ;;  %660 = vmatpush.msrb.mxu0 %v2058_v19 }
  0x65   :  { %718 = vmatpush.msra.mxu3 %v2083_v25  ;;  %699 = vmatpush.msra.mxu2 %v2129_v33 }
  0x66   :  { %680 = vmatpush.msra.mxu1 %v2119_v31  ;;  %661 = vmatpush.msrb.mxu0 %v2088_v26 }
  0x67   :  { %719 = vmatpush.msra.mxu3 %v2112_v30  ;;  %700 = vmatpush.msra.mxu2 %v2179_v41 }
  0x68   :  { %681 = vmatpush.msra.mxu1 %v2146_v36  ;;  %662 = vmatpush.msrb.mxu0 %v2107_v29 }
  0x69   :  { %720 = vmatpush.msra.mxu3 %v2135_v34  ;;  %701 = vmatpush.msra.mxu2 %v2203_v45 }
  0x6a   :  { %682 = vmatpush.msra.mxu1 %v2162_v38  ;;  %663 = vmatpush.msrb.mxu0 %v2124_v32 }
  0x6b   :  { %721 = vmatpush.msra.mxu3 %v2167_v39  ;;  %702 = vmatpush.msra.mxu2 %v2225_v49 }
  0x6c   :  { %683 = vmatpush.msra.mxu1 %v2186_v42  ;;  %664 = vmatpush.msrb.mxu0 %v2154_v37 }
  0x6d   :  { %722 = vmatpush.msra.mxu3 %v2191_v43  ;;  %703 = vmatpush.msra.mxu2 %v2258_v54 }
  0x6e   :  { %684 = vmatpush.msra.mxu1 %v2210_v46  ;;  %665 = vmatpush.msrb.mxu0 %v2174_v40 }
  0x6f   :  { %723 = vmatpush.msra.mxu3 %v2215_v47  ;;  %704 = vmatpush.msra.mxu2 %v2282_v58 }
  0x70   :  { %685 = vmatpush.msra.mxu1 %v2240_v51  ;;  %666 = vmatpush.msrb.mxu0 %v2197_v44 }
  0x71   :  { %724 = vmatpush.msra.mxu3 %v2245_v52  ;;  %705 = vmatpush.msra.mxu2 %v2304_v62 }
  0x72   :  { %686 = vmatpush.msra.mxu1 %v2265_v55  ;;  %667 = vmatpush.msrb.mxu0 %v2232_v50 }
  0x73   :  { %725 = vmatpush.msra.mxu3 %v2270_v56  ;;  %706 = vmatpush.msra.mxu2 %v2337_v3 }
  0x74   :  { %687 = vmatpush.msra.mxu1 %v2289_v59  ;;  %668 = vmatpush.msrb.mxu0 %v2253_v53 }
  0x75   :  { %726 = vmatpush.msra.mxu3 %v2294_v60  ;;  %707 = vmatpush.msra.mxu2 %v2361_v10 }
  0x76   :  { %688 = vmatpush.msra.mxu1 %v2319_v0  ;;  %669 = vmatpush.msrb.mxu0 %v2275_v57 }
  0x77   :  { %727 = vmatpush.msra.mxu3 %v2324_v1  ;;  %708 = vmatpush.msra.mxu2 %v2385_v16 }
  0x78   :  { %689 = vmatpush.msra.mxu1 %v2344_v4  ;;  %670 = vmatpush.msrb.mxu0 %v2311_v63 }
  0x79   :  { %728 = vmatpush.msra.mxu3 %v2349_v8  ;;  %709 = vmatpush.msra.mxu2 %v2408_v20 }
  0x7a   :  { %690 = vmatpush.msra.mxu1 %v2368_v12  ;;  %671 = vmatpush.msrb.mxu0 %v2332_v2 }
  0x7b   :  { %729 = vmatpush.msra.mxu3 %v2373_v13  ;;  %710 = vmatpush.msra.mxu2 %v2427_v35 }
  0x7c   :  { %691 = vmatpush.msra.mxu1 %v2395_v17  ;;  %672 = vmatpush.msrb.mxu0 %v2354_v9  ;;  %v48_v17 = vld [vmem:[%s3446_s3] sm:$0xf] }
  0x7d   :  { %730 = vmatpush.msra.mxu3 %v2401_v18  ;;  %711 = vmatpush.msra.mxu2 %v2446_v21  ;;  %v2637_v20 = vperm.slane %v48_v17, 2 }
  0x7e   :  { %692 = vmatpush.msra.mxu1 %v2415_v22  ;;  %673 = vmatpush.msrb.mxu0 %v3579_v6 }
  0x7f   :  { %731 = vmatpush.msra.mxu3 %v2420_v23  ;;  %712 = vmatpush.msra.mxu2 %v2454_v14  ;;  %v50_v23 = vperm.slane %v48_v17, 0 }
  0x80   :  { %693 = vmatpush.msra.mxu1 %v2433_v48 }
  0x81   :  { %732 = vmatpush.msra.mxu3 %v2438_v61  ;;  %713 = vmatpush.msra.mxu2 %v2471_v15  ;;  %v51_v15 = vperm.slane %v48_v17, 1 }
  0x83   :  { %733 = vmatpush.msra.mxu3 %v2461_v11 }
  0x87   :  { %v100_v9 = vpop.f32.mrf.mxu0  ;;  %v115_v21 = vpop.f32.mrf.mxu1 }
  0x88   :  { %v2621_v22 = vadd.f32 %v115_v21, %v50_v23 }
  0x8a   :  { %3582 = vst [vmem:[#allocation6_spill] sm:$0xff] %v2621_v22 }
  0x8e   :  { %v118_v14 = vpop.f32.mrf.mxu2  ;;  %v121_v2 = vpop.f32.mrf.mxu3 }
  0x8f   :  { %v2623_v61 = vadd.f32 %v118_v14, %v50_v23  ;;  %v2625_v6 = vadd.f32 %v121_v2, %v50_v23  ;;  %v53_v14 = vperm.slane %v48_v17, 3 }
  0x90   :  { %v103_v48 = vpop.f32.mrf.mxu0 }
  0x91   :  { %3583 = vst [vmem:[#allocation7_spill] sm:$0xff] %v2623_v61  ;;  %v2627_v18 = vadd.f32 %v103_v48, %v50_v23  ;;  %v141_v35 = vpop.f32.mrf.mxu1 }
  0x92   :  { %3584 = vst [vmem:[#allocation34_spill] sm:$0xff] %v2625_v6 }
  0x93   :  { %3585 = vst [vmem:[#allocation35_spill] sm:$0xff] %v2627_v18 }
  0x97   :  { %v2629_v12 = vpop.f32.mrf.mxu2 }
  0x98   :  { %v2631_v63 = vpop.f32.mrf.mxu3  ;;  %v106_v11 = vpop.f32.mrf.mxu0 }
  0x99   :  { %v2633_v13 = vadd.f32 %v106_v11, %v50_v23  ;;  %v144_v21 = vpop.f32.mrf.mxu1 }
  0x9a   :  { %v2635_v22 = vadd.f32 %v144_v21, %v51_v15 }
  0x9b   :  { %3586 = vst [vmem:[#allocation36_spill] sm:$0xff] %v2633_v13 }
  0x9c   :  { %3587 = vst [vmem:[#allocation37_spill] sm:$0xff] %v2635_v22 }
  0x9f   :  { %v185_v2 = vpop.f32.mrf.mxu2 }
  0xa0   :  { %v2640_v6 = vadd.f32 %v185_v2, %v2637_v20  ;;  %v226_v48 = vpop.f32.mrf.mxu3  ;;  %v109_v61 = vpop.f32.mrf.mxu0 }
  0xa1   :  { %v2642_v18 = vadd.f32 %v226_v48, %v53_v14  ;;  %v2644_v4 = vadd.f32 %v109_v61, %v50_v23  ;;  %v147_v57 = vpop.f32.mrf.mxu1 }
  0xa2   :  { %3588 = vst [vmem:[#allocation38_spill] sm:$0xff] %v2640_v6  ;;  %v2646_v8 = vadd.f32 %v147_v57, %v51_v15 }
  0xa3   :  { %3589 = vst [vmem:[#allocation39_spill] sm:$0xff] %v2642_v18 }
  0xa4   :  { %3590 = vst [vmem:[#allocation40_spill] sm:$0xff] %v2644_v4 }
  0xa5   :  { %3591 = vst [vmem:[#allocation41_spill] sm:$0xff] %v2646_v8 }
  0xa7   :  { %v188_v11 = vpop.f32.mrf.mxu2 }
  0xa8   :  { %v2649_v21 = vadd.f32 %v188_v11, %v2637_v20  ;;  %v229_v13 = vpop.f32.mrf.mxu3  ;;  %v112_v22 = vpop.f32.mrf.mxu0 }
  0xa9   :  { %v2651_v17 = vadd.f32 %v229_v13, %v53_v14  ;;  %v2653_v16 = vadd.f32 %v112_v22, %v50_v23  ;;  %v150_v2 = vpop.f32.mrf.mxu1 }
  0xaa   :  { %3592 = vst [vmem:[#allocation42_spill] sm:$0xff] %v2649_v21  ;;  %v2655_v6 = vadd.f32 %v150_v2, %v51_v15 }
  0xab   :  { %3593 = vst [vmem:[#allocation43_spill] sm:$0xff] %v2651_v17  ;;  %v101_v17 = vadd.f32 %v100_v9, %v50_v23 }
  0xac   :  { %3594 = vst [vmem:[#allocation44_spill] sm:$0xff] %v2653_v16 }
  0xad   :  { %3595 = vst [vmem:[#allocation45_spill] sm:$0xff] %v2655_v6 }
  0xaf   :  { %v191_v48 = vpop.f32.mrf.mxu2 }
  0xb0   :  { %v2658_v61 = vadd.f32 %v191_v48, %v2637_v20  ;;  %v232_v4 = vpop.f32.mrf.mxu3 }
  0xb1   :  { %v2660_v57 = vadd.f32 %v232_v4, %v53_v14  ;;  %v153_v8 = vpop.f32.mrf.mxu1 }
  0xb2   :  { %3596 = vst [vmem:[#allocation46_spill] sm:$0xff] %v2658_v61  ;;  %v2662_v18 = vadd.f32 %v153_v8, %v51_v15  ;;  %v367_v6 = vpop.f32.mrf.mxu0 }
  0xb3   :  { %3597 = vst [vmem:[#allocation47_spill] sm:$0xff] %v2660_v57  ;;  %v430_v48 = vadd.f32 %v367_v6, %v101_v17 }
  0xb4   :  { %3598 = vst [vmem:[#allocation48_spill] sm:$0xff] %v2662_v18 }
  0xb5   :  { %v1682_v0 = vmul.f32 -1.442695, %v430_v48 }
  0xb7   :  { %v194_v11 = vpop.f32.mrf.mxu2  ;;  %1721 = vpow2.f32 %v1682_v0 }
  0xb8   :  { %v2665_v21 = vadd.f32 %v194_v11, %v2637_v20  ;;  %v235_v13 = vpop.f32.mrf.mxu3 }
  0xb9   :  { %v2667_v22 = vadd.f32 %v235_v13, %v53_v14 }
  0xba   :  { %3599 = vst [vmem:[#allocation49_spill] sm:$0xff] %v2665_v21  ;;  %v156_v16 = vpop.f32.mrf.mxu1 }
  0xbb   :  { %3600 = vst [vmem:[#allocation50_spill] sm:$0xff] %v2667_v22  ;;  %v2669_v2 = vadd.f32 %v156_v16, %v51_v15 }
  0xbd   :  { %3601 = vst [vmem:[#allocation51_spill] sm:$0xff] %v2669_v2  ;;  %v1722_v6 = vpop.eup %1721 }
  0xbe   :  { %v437_v17 = vadd.f32 1.0, %v1722_v6 }
  0xbf   :  { %v197_v61 = vpop.f32.mrf.mxu2 }
  0xc0   :  { %v2672_v4 = vadd.f32 %v197_v61, %v2637_v20  ;;  %v238_v57 = vpop.f32.mrf.mxu3  ;;  %1723 = vrcp.f32 %v437_v17  ;;  %vm443_vm2 = vweird.f32 %v437_v17 }
  0xc1   :  { %v2674_v8 = vadd.f32 %v238_v57, %v53_v14  ;;  %v142_v57 = vadd.f32 %v141_v35, %v51_v15 }
  0xc2   :  { %3602 = vst [vmem:[#allocation52_spill] sm:$0xff] %v2672_v4  ;;  %v159_v18 = vpop.f32.mrf.mxu1 }
  0xc3   :  { %3603 = vst [vmem:[#allocation53_spill] sm:$0xff] %v2674_v8  ;;  %v2676_v11 = vadd.f32 %v159_v18, %v51_v15 }
  0xc5   :  { %3604 = vst [vmem:[#allocation54_spill] sm:$0xff] %v2676_v11 }
  0xc8   :  { %v200_v13 = vpop.f32.mrf.mxu2 }
  0xc9   :  { %v2679_v21 = vadd.f32 %v200_v13, %v2637_v20  ;;  %v241_v16 = vpop.f32.mrf.mxu3 }
  0xca   :  { %v2681_v2 = vadd.f32 %v241_v16, %v53_v14  ;;  %v162_v9 = vpop.f32.mrf.mxu1  ;;  %v224_v16 = vadd.f32 %v2631_v63, %v53_v14 }
  0xcb   :  { %3605 = vst [vmem:[#allocation55_spill] sm:$0xff] %v2679_v21  ;;  %v2683_v23 = vadd.f32 %v162_v9, %v51_v15  ;;  %v1724_v9 = vpop.eup %1723 }
  0xcc   :  { %3606 = vst [vmem:[#allocation56_spill] sm:$0xff] %v2681_v2  ;;  %v439_v8 = vmul.f32 %v1724_v9, %v437_v17  ;;  %vm444_vm1 = vweird.f32 %v1724_v9 }
  0xcd   :  { %3607 = vst [vmem:[#allocation57_spill] sm:$0xff] %v2683_v23  ;;  %vm445_vm4 = vmor %vm443_vm2, %vm444_vm1 }
  0xce   :  { %v440_v35 = vsub.f32 1.0, %v439_v8  ;;  %v447_v8 = vand.u32 2147483647, %v437_v17 }
  0xd0   :  { %v203_v61 = vpop.f32.mrf.mxu2  ;;  %vm448_vm7 = vcmp.eq.f32.partialorder %v447_v8, 8.507059e+37 }
  0xd1   :  { %v2686_v4 = vadd.f32 %v203_v61, %v2637_v20  ;;  %v244_v18 = vpop.f32.mrf.mxu3 }
  0xd2   :  { %v2688_v48 = vadd.f32 %v244_v18, %v53_v14  ;;  %v387_v0 = vpop.f32.mrf.mxu1  ;;  %v183_v18 = vadd.f32 %v2629_v12, %v2637_v20 }
  0xd3   :  { %3608 = vst [vmem:[#allocation58_spill] sm:$0xff] %v2686_v4  ;;  %v431_v11 = vadd.f32 %v387_v0, %v142_v57 }
  0xd4   :  { %3609 = vst [vmem:[#allocation59_spill] sm:$0xff] %v2688_v48 }
  0xd5   :  { %v1683_v13 = vmul.f32 -1.442695, %v431_v11  ;;  %v441_v11 = vmul.f32 %v1724_v9, %v440_v35 }
  0xd7   :  { %1725 = vpow2.f32 %v1683_v13 }
  0xd8   :  { %v407_v61 = vpop.f32.mrf.mxu2 }
  0xd9   :  { %v427_v21 = vpop.f32.mrf.mxu3  ;;  %v432_v0 = vadd.f32 %v407_v61, %v183_v18 }
  0xda   :  { %v433_v23 = vadd.f32 %v427_v21, %v224_v16  ;;  %v442_v21 = vadd.f32 %v1724_v9, %v441_v11 }
  0xdc   :  { %v1684_v2 = vmul.f32 -1.442695, %v433_v23  ;;  %v446_v20 = vsel %vm445_vm4, %v1724_v9, %v442_v21 }
  0xdd   :  { %v1726_v6 = vpop.eup %1725 }
  0xde   :  { %v456_v15 = vadd.f32 1.0, %v1726_v6  ;;  %1727 = vpow2.f32 %v1684_v2  ;;  %v449_v2 = vand.u32 2147483648, %v437_v17 }
  0xe0   :  { %1729 = vrcp.f32 %v456_v15  ;;  %v468_v23 = vand.u32 2147483648, %v456_v15  ;;  %v466_v6 = vand.u32 2147483647, %v456_v15  ;;  %vm462_vm5 = vweird.f32 %v456_v15 }
  0xe2   :  { %v469_v18 = vor.u32 1.1754944e-38, %v468_v23  ;;  %vm467_vm8 = vcmp.eq.f32.partialorder %v466_v6, 8.507059e+37 }
  0xe4   :  { %v1728_v57 = vpop.eup %1727 }
  0xe5   :  { %v476_v13 = vadd.f32 1.0, %v1728_v57  ;;  %v450_v57 = vor.u32 1.1754944e-38, %v449_v2 }
  0xe6   :  { %v1730_v4 = vpop.eup %1729 }
  0xe7   :  { %v458_v63 = vmul.f32 %v1730_v4, %v456_v15  ;;  %1731 = vrcp.f32 %v476_v13  ;;  %vm463_vm3 = vweird.f32 %v1730_v4  ;;  %v488_v9 = vand.u32 2147483648, %v476_v13 }
  0xe8   :  { %1733 = vtanh.f32 %v432_v0  ;;  %vm464_vm6 = vmor %vm462_vm5, %vm463_vm3  ;;  %vm482_vm10 = vweird.f32 %v476_v13  ;;  %v486_v15 = vand.u32 2147483647, %v476_v13 }
  0xe9   :  { %v459_v14 = vsub.f32 1.0, %v458_v63  ;;  %v451_v63 = vsel %vm448_vm7, %v450_v57, %v446_v20  ;;  %v489_v23 = vor.u32 1.1754944e-38, %v488_v9  ;;  %v3639_v20 = vld [vmem:[#allocation38_spill] sm:$0xff] }
  0xea   :  { %vm487_vm12 = vcmp.eq.f32.partialorder %v486_v15, 8.507059e+37 }
  0xeb   :  { %v460_v16 = vmul.f32 %v1730_v4, %v459_v14 }
  0xed   :  { %v1732_v12 = vpop.eup %1731  ;;  %v461_v35 = vadd.f32 %v1730_v4, %v460_v16 }
  0xee   :  { %v1734_v61 = vpop.eup %1733  ;;  %v478_v0 = vmul.f32 %v1732_v12, %v476_v13  ;;  %vm483_vm9 = vweird.f32 %v1732_v12 }
  0xef   :  { %v465_v11 = vsel %vm464_vm6, %v1730_v4, %v461_v35  ;;  %v493_v17 = vmul.f32 %v1734_v61, %v451_v63  ;;  %vm484_vm11 = vmor %vm482_vm10, %vm483_vm9 }
  0xf0   :  { %v470_v48 = vsel %vm467_vm8, %v469_v18, %v465_v11  ;;  %v479_v22 = vsub.f32 1.0, %v478_v0 }
  0xf1   :  { %v492_v14 = vmul.f32 0.0, %v470_v48 }
  0xf2   :  { %v480_v53 = vmul.f32 %v1732_v12, %v479_v22 }
  0xf3   :  { %v2693_v1 = vadd.f32 %v493_v17, %v492_v14 }
  0xf4   :  { %v481_v10 = vadd.f32 %v1732_v12, %v480_v53  ;;  %v3636_v53 = vld [vmem:[#allocation35_spill] sm:$0xff] }
  0xf5   :  { %1735 = vtanh.f32 %v2693_v1 }
  0xf6   :  { %v485_v21 = vsel %vm484_vm11, %v1732_v12, %v481_v10 }
  0xf7   :  { %v490_v2 = vsel %vm487_vm12, %v489_v23, %v485_v21 }
  0xfb   :  { %v1736_v4 = vpop.eup %1735 }
  0xfc   :  { %v496_v16 = vmul.f32 %v1736_v4, %v490_v2 }
  0xfe   :  { %520 = vmatmul.f32.vlgmr.msra.gmra.mxu0 %v496_v16  ;;  %540 = vmatmul.f32.vlgmr.msrb.gmra.mxu1 %v496_v16 }
  0xff   :  { %560 = vmatmul.f32.vlgmr.msrb.gmra.mxu2 %v496_v16  ;;  %580 = vmatmul.f32.vlgmr.msrb.gmra.mxu3 %v496_v16 }
 0x100   :  { %812 = vmatpush.msra.mxu0 %v3580_v7  ;;  %832 = vmatpush.msrb.mxu1 %v2077_v24  ;;  %v3611_v24 = vld [vmem:[#allocation12_spill] sm:$0xff] }
 0x101   :  { %852 = vmatpush.msrb.mxu2 %v2100_v28  ;;  %872 = vmatpush.msrb.mxu3 %v2083_v25  ;;  %v3612_v25 = vld [vmem:[#allocation8_spill] sm:$0xff]  ;;  %v3615_v28 = vld [vmem:[#allocation15_spill] sm:$0xff] }
 0x102   :  { %813 = vmatpush.msra.mxu0 %v3581_v5  ;;  %833 = vmatpush.msrb.mxu1 %v2095_v27  ;;  %v3614_v27 = vld [vmem:[#allocation21_spill] sm:$0xff] }
 0x103   :  { %853 = vmatpush.msrb.mxu2 %v2129_v33  ;;  %873 = vmatpush.msrb.mxu3 %v2112_v30  ;;  %v3617_v30 = vld [vmem:[#allocation14_spill] sm:$0xff] }
 0x104   :  { %814 = vmatpush.msra.mxu0 %v2058_v19  ;;  %834 = vmatpush.msrb.mxu1 %v2119_v31  ;;  %v3610_v19 = vld [vmem:[#allocation17_spill] sm:$0xff]  ;;  %v3618_v31 = vld [vmem:[#allocation24_spill] sm:$0xff]  ;;  %v3620_v33 = vld [vmem:[#allocation10_spill] sm:$0xff] }
 0x105   :  { %854 = vmatpush.msrb.mxu2 %v2179_v41  ;;  %874 = vmatpush.msrb.mxu3 %v2135_v34  ;;  %v3621_v34 = vld [vmem:[#allocation18_spill] sm:$0xff] }
 0x106   :  { %815 = vmatpush.msra.mxu0 %v2088_v26  ;;  %835 = vmatpush.msrb.mxu1 %v2146_v36  ;;  %v3613_v26 = vld [vmem:[#allocation11_spill] sm:$0xff]  ;;  %v3627_v41 = vld [vmem:[#allocation26_spill] sm:$0xff] }
 0x107   :  { %855 = vmatpush.msrb.mxu2 %v2203_v45  ;;  %875 = vmatpush.msrb.mxu3 %v2167_v39  ;;  %v3622_v36 = vld [vmem:[#allocation27_spill] sm:$0xff]  ;;  %v3625_v39 = vld [vmem:[#allocation22_spill] sm:$0xff]  ;;  %v3631_v45 = vld [vmem:[#allocation29_spill] sm:$0xff] }
 0x108   :  { %816 = vmatpush.msra.mxu0 %v2107_v29  ;;  %836 = vmatpush.msrb.mxu1 %v2162_v38  ;;  %v3616_v29 = vld [vmem:[#allocation9_spill] sm:$0xff] }
 0x109   :  { %856 = vmatpush.msrb.mxu2 %v2225_v49  ;;  %876 = vmatpush.msrb.mxu3 %v2191_v43  ;;  %v3624_v38 = vld [vmem:[#allocation13_spill] sm:$0xff] }
 0x10a   :  { %817 = vmatpush.msra.mxu0 %v2124_v32  ;;  %837 = vmatpush.msrb.mxu1 %v2186_v42  ;;  %v3619_v32 = vld [vmem:[#allocation19_spill] sm:$0xff]  ;;  %v3628_v42 = vld [vmem:[#allocation16_spill] sm:$0xff]  ;;  %v3629_v43 = vld [vmem:[#allocation25_spill] sm:$0xff] }
 0x10b   :  { %857 = vmatpush.msrb.mxu2 %v2258_v54  ;;  %877 = vmatpush.msrb.mxu3 %v2215_v47  ;;  %v3633_v47 = vld [vmem:[#allocation28_spill] sm:$0xff]  ;;  %v3634_v49 = vld [vmem:[#allocation33_spill] sm:$0xff] }
 0x10c   :  { %818 = vmatpush.msra.mxu0 %v2154_v37  ;;  %838 = vmatpush.msrb.mxu1 %v2210_v46  ;;  %v3623_v37 = vld [vmem:[#allocation23_spill] sm:$0xff]  ;;  %v3632_v46 = vld [vmem:[#allocation20_spill] sm:$0xff] }
 0x10d   :  { %858 = vmatpush.msrb.mxu2 %v2282_v58  ;;  %878 = vmatpush.msrb.mxu3 %v2245_v52 }
 0x10e   :  { %819 = vmatpush.msra.mxu0 %v2174_v40  ;;  %839 = vmatpush.msrb.mxu1 %v2240_v51  ;;  %v3626_v40 = vld [vmem:[#allocation30_spill] sm:$0xff] }
 0x10f   :  { %859 = vmatpush.msrb.mxu2 %v2304_v62  ;;  %879 = vmatpush.msrb.mxu3 %v2270_v56  ;;  %v3638_v62 = vld [vmem:[#allocation39_spill] sm:$0xff] }
 0x110   :  { %820 = vmatpush.msra.mxu0 %v2197_v44  ;;  %840 = vmatpush.msrb.mxu1 %v2265_v55  ;;  %v3630_v44 = vld [vmem:[#allocation31_spill] sm:$0xff]  ;;  %v3637_v55 = vld [vmem:[#allocation37_spill] sm:$0xff] }
 0x111   :  { %860 = vmatpush.msrb.mxu2 %v2337_v3  ;;  %880 = vmatpush.msrb.mxu3 %v2294_v60 }
 0x112   :  { %821 = vmatpush.msra.mxu0 %v2232_v50  ;;  %841 = vmatpush.msrb.mxu1 %v2289_v59  ;;  %v3635_v50 = vld [vmem:[#allocation32_spill] sm:$0xff] }
 0x113   :  { %861 = vmatpush.msrb.mxu2 %v3610_v19  ;;  %881 = vmatpush.msrb.mxu3 %v3611_v24 }
 0x114   :  { %822 = vmatpush.msra.mxu0 %v3612_v25  ;;  %842 = vmatpush.msrb.mxu1 %v3613_v26 }
 0x115   :  { %862 = vmatpush.msrb.mxu2 %v3614_v27  ;;  %882 = vmatpush.msrb.mxu3 %v3615_v28 }
 0x116   :  { %823 = vmatpush.msra.mxu0 %v3616_v29  ;;  %843 = vmatpush.msrb.mxu1 %v3617_v30 }
 0x117   :  { %863 = vmatpush.msrb.mxu2 %v3618_v31  ;;  %883 = vmatpush.msrb.mxu3 %v3619_v32 }
 0x118   :  { %824 = vmatpush.msra.mxu0 %v3620_v33  ;;  %844 = vmatpush.msrb.mxu1 %v3621_v34 }
 0x119   :  { %864 = vmatpush.msrb.mxu2 %v3622_v36  ;;  %884 = vmatpush.msrb.mxu3 %v3623_v37 }
 0x11a   :  { %825 = vmatpush.msra.mxu0 %v3624_v38  ;;  %845 = vmatpush.msrb.mxu1 %v3625_v39 }
 0x11b   :  { %865 = vmatpush.msrb.mxu2 %v3626_v40  ;;  %885 = vmatpush.msrb.mxu3 %v3627_v41 }
 0x11c   :  { %826 = vmatpush.msra.mxu0 %v3628_v42  ;;  %846 = vmatpush.msrb.mxu1 %v3629_v43 }
 0x11d   :  { %866 = vmatpush.msrb.mxu2 %v3630_v44  ;;  %886 = vmatpush.msrb.mxu3 %v3631_v45 }
 0x11e   :  { %827 = vmatpush.msra.mxu0 %v3632_v46  ;;  %847 = vmatpush.msrb.mxu1 %v3633_v47 }
 0x11f   :  { %867 = vmatpush.msrb.mxu2 %v3634_v49  ;;  %887 = vmatpush.msrb.mxu3 %v3635_v50 }
 0x17b   :  { %v521_v51 = vpop.f32.mrf.mxu0  ;;  %v541_v52 = vpop.f32.mrf.mxu1 }
 0x17c   :  { %v584_v54 = vadd.f32 %v521_v51, %v3636_v53  ;;  %v585_v56 = vadd.f32 %v541_v52, %v3637_v55 }
 0x17e   :  { %v1685_v58 = vmul.f32 -1.442695, %v584_v54  ;;  %v1686_v59 = vmul.f32 -1.442695, %v585_v56 }
 0x180   :  { %1737 = vpow2.f32 %v1685_v58 }
 0x181   :  { %1739 = vpow2.f32 %v1686_v59 }
 0x182   :  { %v581_v60 = vpop.f32.mrf.mxu3  ;;  %v561_v13 = vpop.f32.mrf.mxu2 }
 0x183   :  { %v587_v3 = vadd.f32 %v581_v60, %v3638_v62  ;;  %v586_v35 = vadd.f32 %v561_v13, %v3639_v20  ;;  %v2777_v60 = vld [vmem:[%s3445_s2 + $0x1e8] sm:$0xff]  ;;  %v2783_v62 = vld [vmem:[%s3445_s2 + $0x1f0] sm:$0xff] }
 0x184   :  { %v2825_v13 = vld [vmem:[%s3445_s2 + $0x1a8] sm:$0xff] }
 0x185   :  { %v1687_v10 = vmul.f32 -1.442695, %v587_v3  ;;  %v2789_v3 = vld [vmem:[%s3445_s2 + $0x1f8] sm:$0xff]  ;;  %v2849_v20 = vld [vmem:[%s3445_s2 + $0x188] sm:$0xff] }
 0x186   :  { %v1738_v7 = vpop.eup %1737 }
 0x187   :  { %v1740_v5 = vpop.eup %1739  ;;  %v591_v22 = vadd.f32 1.0, %v1738_v7  ;;  %1741 = vpow2.f32 %v1687_v10  ;;  %v2795_v10 = vld [vmem:[%s3445_s2 + $0x1c0] sm:$0xff]  ;;  %v2801_v7 = vld [vmem:[%s3445_s2 + $0x1c8] sm:$0xff] }
 0x188   :  { %v610_v48 = vadd.f32 1.0, %v1740_v5  ;;  %v2807_v5 = vld [vmem:[%s3445_s2 + $0x1d0] sm:$0xff] }
 0x189   :  { %1743 = vrcp.f32 %v591_v22  ;;  %v603_v63 = vand.u32 2147483648, %v591_v22  ;;  %v601_v9 = vand.u32 2147483647, %v591_v22  ;;  %vm597_vm15 = vweird.f32 %v591_v22 }
 0x18a   :  { %1745 = vrcp.f32 %v610_v48  ;;  %v622_v14 = vand.u32 2147483648, %v610_v48  ;;  %v620_v21 = vand.u32 2147483647, %v610_v48  ;;  %vm616_vm0 = vweird.f32 %v610_v48 }
 0x18b   :  { %v604_v2 = vor.u32 1.1754944e-38, %v603_v63  ;;  %vm602_vm3 = vcmp.eq.f32.partialorder %v601_v9, 8.507059e+37  ;;  %v2891_v63 = vld [vmem:[%s3445_s2 + $0x140] sm:$0xff]  ;;  %v2909_v9 = vld [vmem:[%s3445_s2 + $0x158] sm:$0xff] }
 0x18c   :  { %v623_v25 = vor.u32 1.1754944e-38, %v622_v14  ;;  %vm621_vm4 = vcmp.eq.f32.partialorder %v620_v21, 8.507059e+37  ;;  %v2897_v14 = vld [vmem:[%s3445_s2 + $0x148] sm:$0xff] }
 0x18d   :  { %v1742_v8 = vpop.eup %1741  ;;  %v2921_v21 = vld [vmem:[%s3445_s2 + $0x128] sm:$0xff] }
 0x18e   :  { %v630_v6 = vadd.f32 1.0, %v1742_v8  ;;  %v2831_v8 = vld [vmem:[%s3445_s2 + $0x1b0] sm:$0xff] }
 0x18f   :  { %v1744_v12 = vpop.eup %1743 }
 0x190   :  { %v1746_v61 = vpop.eup %1745  ;;  %v593_v18 = vmul.f32 %v1744_v12, %v591_v22  ;;  %1747 = vrcp.f32 %v630_v6  ;;  %vm598_vm13 = vweird.f32 %v1744_v12  ;;  %v642_v52 = vand.u32 2147483648, %v630_v6  ;;  %v2813_v22 = vld [vmem:[%s3445_s2 + $0x1d8] sm:$0xff] }
 0x191   :  { %v612_v57 = vmul.f32 %v1746_v61, %v610_v48  ;;  %1749 = vtanh.f32 %v586_v35  ;;  %vm617_vm14 = vweird.f32 %v1746_v61  ;;  %vm599_vm1 = vmor %vm597_vm15, %vm598_vm13  ;;  %vm636_vm6 = vweird.f32 %v630_v6  ;;  %v2819_v48 = vld [vmem:[%s3445_s2 + $0x1a0] sm:$0xff]  ;;  %v2855_v35 = vld [vmem:[%s3445_s2 + $0x190] sm:$0xff] }
 0x192   :  { %v594_v0 = vsub.f32 1.0, %v593_v18  ;;  %vm618_vm2 = vmor %vm616_vm0, %vm617_vm14  ;;  %v640_v53 = vand.u32 2147483647, %v630_v6  ;;  %v643_v55 = vor.u32 1.1754944e-38, %v642_v52  ;;  %v2867_v18 = vld [vmem:[%s3445_s2 + $0x160] sm:$0xff]  ;;  %v3031_v52 = vld [vmem:[%s3445_s2 + $0x88] sm:$0xff] }
 0x193   :  { %v613_v11 = vsub.f32 1.0, %v612_v57  ;;  %v2873_v57 = vld [vmem:[%s3445_s2 + $0x168] sm:$0xff]  ;;  %3645 = vst [vmem:[#allocation15_spill] sm:$0xff] %v3031_v52 }
 0x194   :  { %v595_v17 = vmul.f32 %v1744_v12, %v594_v0  ;;  %vm641_vm8 = vcmp.eq.f32.partialorder %v640_v53, 8.507059e+37  ;;  %v2879_v0 = vld [vmem:[%s3445_s2 + $0x170] sm:$0xff]  ;;  %v3044_v53 = vld [vmem:[%s3445_s2 + $0x60] sm:$0xff] }
 0x195   :  { %v614_v15 = vmul.f32 %v1746_v61, %v613_v11  ;;  %v2885_v11 = vld [vmem:[%s3445_s2 + $0x178] sm:$0xff]  ;;  %3647 = vst [vmem:[#allocation14_spill] sm:$0xff] %v3044_v53 }
 0x196   :  { %v1748_v23 = vpop.eup %1747  ;;  %v596_v4 = vadd.f32 %v1744_v12, %v595_v17  ;;  %v2903_v17 = vld [vmem:[%s3445_s2 + $0x150] sm:$0xff] }
 0x197   :  { %v615_v16 = vadd.f32 %v1746_v61, %v614_v15  ;;  %v632_v24 = vmul.f32 %v1748_v23, %v630_v6  ;;  %v1750_v28 = vpop.eup %1749  ;;  %vm637_vm5 = vweird.f32 %v1748_v23  ;;  %v2837_v6 = vld [vmem:[%s3445_s2 + $0x1b8] sm:$0xff]  ;;  %v2915_v15 = vld [vmem:[%s3445_s2 + $0x120] sm:$0xff] }
 0x198   :  { %v600_v26 = vsel %vm599_vm1, %v1744_v12, %v596_v4  ;;  %vm638_vm7 = vmor %vm636_vm6, %vm637_vm5  ;;  %v2843_v12 = vld [vmem:[%s3445_s2 + $0x180] sm:$0xff]  ;;  %v2933_v4 = vld [vmem:[%s3445_s2 + $0x138] sm:$0xff] }
 0x199   :  { %v605_v29 = vsel %vm602_vm3, %v604_v2, %v600_v26  ;;  %v619_v30 = vsel %vm618_vm2, %v1746_v61, %v615_v16  ;;  %v633_v32 = vsub.f32 1.0, %v632_v24  ;;  %v2861_v61 = vld [vmem:[%s3445_s2 + $0x198] sm:$0xff]  ;;  %v2939_v2 = vld [vmem:[%s3445_s2 + $0x100] sm:$0xff]  ;;  %v2945_v16 = vld [vmem:[%s3445_s2 + $0x108] sm:$0xff] }
 0x19a   :  { %v624_v33 = vsel %vm621_vm4, %v623_v25, %v619_v30  ;;  %v647_v34 = vmul.f32 %v1750_v28, %v605_v29  ;;  %v2951_v24 = vld [vmem:[%s3445_s2 + $0x110] sm:$0xff]  ;;  %v2957_v25 = vld [vmem:[%s3445_s2 + $0x118] sm:$0xff]  ;;  %v2963_v26 = vld [vmem:[%s3445_s2 + $0xe0] sm:$0xff] }
 0x19b   :  { %v646_v38 = vmul.f32 %v624_v33, %v2693_v1  ;;  %v634_v42 = vmul.f32 %v1748_v23, %v633_v32  ;;  %v2771_v1 = vld [vmem:[%s3445_s2 + $0x1e0] sm:$0xff]  ;;  %v2969_v28 = vld [vmem:[%s3445_s2 + $0xe8] sm:$0xff]  ;;  %v2975_v29 = vld [vmem:[%s3445_s2 + $0xf0] sm:$0xff] }
 0x19c   :  { %v2981_v30 = vld [vmem:[%s3445_s2 + $0xf8] sm:$0xff]  ;;  %v2987_v32 = vld [vmem:[%s3445_s2 + $0xc0] sm:$0xff]  ;;  %v2993_v33 = vld [vmem:[%s3445_s2 + $0xc8] sm:$0xff] }
 0x19d   :  { %v2765_v46 = vadd.f32 %v647_v34, %v646_v38  ;;  %v635_v51 = vadd.f32 %v1748_v23, %v634_v42  ;;  %v3000_v34 = vld [vmem:[%s3445_s2 + $0xd8] sm:$0xff]  ;;  %v3006_v38 = vld [vmem:[%s3445_s2 + $0xa0] sm:$0xff]  ;;  %v3012_v42 = vld [vmem:[%s3445_s2 + $0xa8] sm:$0xff] }
 0x19e   :  { %3640 = vst [vmem:[#allocation17_spill] sm:$0xff] %v3000_v34 }
 0x19f   :  { %1751 = vtanh.f32 %v2765_v46  ;;  %v639_v54 = vsel %vm638_vm7, %v1748_v23, %v635_v51  ;;  %v2927_v23 = vld [vmem:[%s3445_s2 + $0x130] sm:$0xff]  ;;  %3641 = vst [vmem:[#allocation12_spill] sm:$0xff] %v3006_v38  ;;  %v3025_v51 = vld [vmem:[%s3445_s2 + $0x80] sm:$0xff] }
 0x1a0   :  { %v644_v58 = vsel %vm641_vm8, %v643_v55, %v639_v54  ;;  %3642 = vst [vmem:[#allocation8_spill] sm:$0xff] %v3012_v42  ;;  %v3050_v54 = vld [vmem:[%s3445_s2 + $0x68] sm:$0xff]  ;;  %v3067_v55 = vld [vmem:[%s3445_s2 + $0x20] sm:$0xff] }
 0x1a1   :  { %3644 = vst [vmem:[#allocation21_spill] sm:$0xff] %v3025_v51 }
 0x1a2   :  { %3648 = vst [vmem:[#allocation24_spill] sm:$0xff] %v3050_v54 }
 0x1a3   :  { %3650 = vst [vmem:[#allocation10_spill] sm:$0xff] %v3067_v55 }
 0x1a5   :  { %v1752_v56 = vpop.eup %1751 }
 0x1a6   :  { %v650_v59 = vmul.f32 %v1752_v56, %v644_v58 }
 0x1a8   :  { %674 = vmatmul.f32.vlgmr.msrb.gmra.mxu0 %v650_v59  ;;  %694 = vmatmul.f32.vlgmr.msra.gmra.mxu1 %v650_v59 }
 0x1a9   :  { %714 = vmatmul.f32.vlgmr.msra.gmra.mxu2 %v650_v59  ;;  %734 = vmatmul.f32.vlgmr.msra.gmra.mxu3 %v650_v59  ;;  %v3654_v59 = vld [vmem:[#allocation43_spill] sm:$0xff] }
 0x1aa   :  { %966 = vmatpush.msrb.mxu0 %v2771_v1  ;;  %986 = vmatpush.msra.mxu1 %v2777_v60 }
 0x1ab   :  { %1006 = vmatpush.msra.mxu2 %v2783_v62  ;;  %1026 = vmatpush.msra.mxu3 %v2789_v3 }
 0x1ac   :  { %967 = vmatpush.msrb.mxu0 %v2795_v10  ;;  %987 = vmatpush.msra.mxu1 %v2801_v7 }
 0x1ad   :  { %1007 = vmatpush.msra.mxu2 %v2807_v5  ;;  %1027 = vmatpush.msra.mxu3 %v2813_v22 }
 0x1ae   :  { %968 = vmatpush.msrb.mxu0 %v2819_v48  ;;  %988 = vmatpush.msra.mxu1 %v2825_v13 }
 0x1af   :  { %1008 = vmatpush.msra.mxu2 %v2831_v8  ;;  %1028 = vmatpush.msra.mxu3 %v2837_v6 }
 0x1b0   :  { %969 = vmatpush.msrb.mxu0 %v2843_v12  ;;  %989 = vmatpush.msra.mxu1 %v2849_v20 }
 0x1b1   :  { %1009 = vmatpush.msra.mxu2 %v2855_v35  ;;  %1029 = vmatpush.msra.mxu3 %v2861_v61 }
 0x1b2   :  { %970 = vmatpush.msrb.mxu0 %v2867_v18  ;;  %990 = vmatpush.msra.mxu1 %v2873_v57 }
 0x1b3   :  { %1010 = vmatpush.msra.mxu2 %v2879_v0  ;;  %1030 = vmatpush.msra.mxu3 %v2885_v11 }
 0x1b4   :  { %971 = vmatpush.msrb.mxu0 %v2891_v63  ;;  %991 = vmatpush.msra.mxu1 %v2897_v14 }
 0x1b5   :  { %1011 = vmatpush.msra.mxu2 %v2903_v17  ;;  %1031 = vmatpush.msra.mxu3 %v2909_v9 }
 0x1b6   :  { %972 = vmatpush.msrb.mxu0 %v2915_v15  ;;  %992 = vmatpush.msra.mxu1 %v2921_v21 }
 0x1b7   :  { %1012 = vmatpush.msra.mxu2 %v2927_v23  ;;  %1032 = vmatpush.msra.mxu3 %v2933_v4 }
 0x1b8   :  { %973 = vmatpush.msrb.mxu0 %v2939_v2  ;;  %993 = vmatpush.msra.mxu1 %v2945_v16 }
 0x1b9   :  { %1013 = vmatpush.msra.mxu2 %v2951_v24  ;;  %1033 = vmatpush.msra.mxu3 %v2957_v25 }
 0x1ba   :  { %974 = vmatpush.msrb.mxu0 %v2963_v26  ;;  %994 = vmatpush.msra.mxu1 %v2969_v28 }
 0x1bb   :  { %1014 = vmatpush.msra.mxu2 %v2975_v29  ;;  %1034 = vmatpush.msra.mxu3 %v2981_v30 }
 0x1bc   :  { %975 = vmatpush.msrb.mxu0 %v2987_v32  ;;  %995 = vmatpush.msra.mxu1 %v2993_v33 }
 0x1bd   :  { %1015 = vmatpush.msra.mxu2 %v3610_v19  ;;  %1035 = vmatpush.msra.mxu3 %v3000_v34  ;;  %v3019_v19 = vld [vmem:[%s3445_s2 + $0xb8] sm:$0xff] }
 0x1be   :  { %976 = vmatpush.msrb.mxu0 %v3006_v38  ;;  %996 = vmatpush.msra.mxu1 %v3012_v42  ;;  %3643 = vst [vmem:[#allocation11_spill] sm:$0xff] %v3019_v19 }
 0x1bf   :  { %1016 = vmatpush.msra.mxu2 %v3614_v27  ;;  %1036 = vmatpush.msra.mxu3 %v3019_v19  ;;  %v3038_v27 = vld [vmem:[%s3445_s2 + $0x98] sm:$0xff] }
 0x1c0   :  { %977 = vmatpush.msrb.mxu0 %v3025_v51  ;;  %997 = vmatpush.msra.mxu1 %v3031_v52  ;;  %3646 = vst [vmem:[#allocation9_spill] sm:$0xff] %v3038_v27 }
 0x1c1   :  { %1017 = vmatpush.msra.mxu2 %v3618_v31  ;;  %1037 = vmatpush.msra.mxu3 %v3038_v27  ;;  %v3058_v31 = vld [vmem:[%s3445_s2 + $0x40] sm:$0xff] }
 0x1c2   :  { %978 = vmatpush.msrb.mxu0 %v3044_v53  ;;  %998 = vmatpush.msra.mxu1 %v3050_v54  ;;  %3649 = vst [vmem:[#allocation19_spill] sm:$0xff] %v3058_v31 }
 0x1c3   :  { %1018 = vmatpush.msra.mxu2 %v3622_v36  ;;  %1038 = vmatpush.msra.mxu3 %v3623_v37  ;;  %v3076_v36 = vld [vmem:[%s3445_s2] sm:$0xff] }
 0x1c4   :  { %979 = vmatpush.msrb.mxu0 %v3058_v31  ;;  %999 = vmatpush.msra.mxu1 %v3625_v39  ;;  %3651 = vst [vmem:[#allocation18_spill] sm:$0xff] %v3076_v36 }
 0x1c5   :  { %1019 = vmatpush.msra.mxu2 %v3626_v40  ;;  %1039 = vmatpush.msra.mxu3 %v3627_v41  ;;  %v3652_v40 = vld [vmem:[#allocation36_spill] sm:$0xff] }
 0x1c6   :  { %980 = vmatpush.msrb.mxu0 %v3067_v55  ;;  %1000 = vmatpush.msra.mxu1 %v3629_v43  ;;  %v3653_v43 = vld [vmem:[#allocation41_spill] sm:$0xff] }
 0x1c7   :  { %1020 = vmatpush.msra.mxu2 %v3630_v44  ;;  %1040 = vmatpush.msra.mxu3 %v3631_v45 }
 0x1c8   :  { %981 = vmatpush.msrb.mxu0 %v3076_v36  ;;  %1001 = vmatpush.msra.mxu1 %v3633_v47 }
 0x1c9   :  { %1021 = vmatpush.msra.mxu2 %v3634_v49  ;;  %1041 = vmatpush.msra.mxu3 %v3635_v50 }
 0x225   :  { %v675_v37 = vpop.f32.mrf.mxu0  ;;  %v695_v39 = vpop.f32.mrf.mxu1 }
 0x226   :  { %v738_v41 = vadd.f32 %v675_v37, %v3652_v40  ;;  %v739_v44 = vadd.f32 %v695_v39, %v3653_v43  ;;  %v3655_v39 = vld [vmem:[#allocation42_spill] sm:$0xff] }
 0x228   :  { %v1688_v45 = vmul.f32 -1.442695, %v738_v41  ;;  %v1689_v56 = vmul.f32 -1.442695, %v739_v44 }
 0x22a   :  { %1753 = vpow2.f32 %v1688_v45 }
 0x22b   :  { %1755 = vpow2.f32 %v1689_v56 }
 0x22c   :  { %v735_v58 = vpop.f32.mrf.mxu3  ;;  %v715_v50 = vpop.f32.mrf.mxu2 }
 0x22d   :  { %v741_v55 = vadd.f32 %v735_v58, %v3654_v59  ;;  %v740_v41 = vadd.f32 %v715_v50, %v3655_v39 }
 0x22f   :  { %v1690_v36 = vmul.f32 -1.442695, %v741_v55 }
 0x230   :  { %v1754_v31 = vpop.eup %1753 }
 0x231   :  { %v1756_v47 = vpop.eup %1755  ;;  %v745_v54 = vadd.f32 1.0, %v1754_v31  ;;  %1757 = vpow2.f32 %v1690_v36 }
 0x232   :  { %v764_v49 = vadd.f32 1.0, %v1756_v47 }
 0x233   :  { %1759 = vrcp.f32 %v745_v54  ;;  %v757_v55 = vand.u32 2147483648, %v745_v54  ;;  %v755_v36 = vand.u32 2147483647, %v745_v54  ;;  %vm751_vm11 = vweird.f32 %v745_v54 }
 0x234   :  { %1761 = vrcp.f32 %v764_v49  ;;  %v776_v59 = vand.u32 2147483648, %v764_v49  ;;  %v774_v27 = vand.u32 2147483647, %v764_v49  ;;  %vm770_vm12 = vweird.f32 %v764_v49 }
 0x235   :  { %v758_v50 = vor.u32 1.1754944e-38, %v757_v55  ;;  %vm756_vm15 = vcmp.eq.f32.partialorder %v755_v36, 8.507059e+37 }
 0x236   :  { %vm775_vm0 = vcmp.eq.f32.partialorder %v774_v27, 8.507059e+37 }
 0x237   :  { %v1758_v53 = vpop.eup %1757 }
 0x238   :  { %v784_v37 = vadd.f32 1.0, %v1758_v53 }
 0x239   :  { %v1760_v40 = vpop.eup %1759 }
 0x23a   :  { %v1762_v43 = vpop.eup %1761  ;;  %v747_v44 = vmul.f32 %v1760_v40, %v745_v54  ;;  %1763 = vrcp.f32 %v784_v37  ;;  %vm752_vm9 = vweird.f32 %v1760_v40  ;;  %v796_v55 = vand.u32 2147483648, %v784_v37 }
 0x23b   :  { %v766_v45 = vmul.f32 %v1762_v43, %v764_v49  ;;  %1765 = vtanh.f32 %v740_v41  ;;  %vm771_vm10 = vweird.f32 %v1762_v43  ;;  %vm753_vm13 = vmor %vm751_vm11, %vm752_vm9  ;;  %vm790_vm2 = vweird.f32 %v784_v37 }
 0x23c   :  { %v748_v56 = vsub.f32 1.0, %v747_v44  ;;  %vm772_vm14 = vmor %vm770_vm12, %vm771_vm10  ;;  %v777_v44 = vor.u32 1.1754944e-38, %v776_v59  ;;  %v797_v36 = vor.u32 1.1754944e-38, %v796_v55  ;;  %v3674_v55 = vld [vmem:[#allocation10_spill] sm:$0xff] }
 0x23d   :  { %v767_v58 = vsub.f32 1.0, %v766_v45 }
 0x23e   :  { %v749_v31 = vmul.f32 %v1760_v40, %v748_v56 }
 0x23f   :  { %v768_v47 = vmul.f32 %v1762_v43, %v767_v58 }
 0x240   :  { %v1764_v52 = vpop.eup %1763  ;;  %v750_v53 = vadd.f32 %v1760_v40, %v749_v31 }
 0x241   :  { %v769_v39 = vadd.f32 %v1762_v43, %v768_v47  ;;  %v786_v51 = vmul.f32 %v1764_v52, %v784_v37  ;;  %v1766_v41 = vpop.eup %1765  ;;  %vm791_vm1 = vweird.f32 %v1764_v52  ;;  %v3663_v47 = vld [vmem:[#allocation15_spill] sm:$0xff] }
 0x242   :  { %v754_v45 = vsel %vm753_vm13, %v1760_v40, %v750_v53  ;;  %v794_v40 = vand.u32 2147483647, %v784_v37  ;;  %vm792_vm3 = vmor %vm790_vm2, %vm791_vm1  ;;  %v3662_v37 = vld [vmem:[#allocation21_spill] sm:$0xff]  ;;  %v3149_v53 = vld [vmem:[%s3445_s2 + $0x90] sm:$0xff] }
 0x243   :  { %v759_v19 = vsel %vm756_vm15, %v758_v50, %v754_v45  ;;  %v773_v56 = vsel %vm772_vm14, %v1762_v43, %v769_v39  ;;  %v787_v42 = vsub.f32 1.0, %v786_v51  ;;  %3664 = vst [vmem:[#allocation13_spill] sm:$0xff] %v3149_v53  ;;  %v3665_v50 = vld [vmem:[#allocation9_spill] sm:$0xff]  ;;  %v3666_v39 = vld [vmem:[#allocation14_spill] sm:$0xff]  ;;  %v3158_v45 = vld [vmem:[%s3445_s2 + $0x70] sm:$0xff] }
 0x244   :  { %v778_v58 = vsel %vm775_vm0, %v777_v44, %v773_v56  ;;  %v801_v38 = vmul.f32 %v1766_v41, %v759_v19  ;;  %vm795_vm4 = vcmp.eq.f32.partialorder %v794_v40, 8.507059e+37  ;;  %v3140_v19 = vld [vmem:[%s3445_s2 + $0xb0] sm:$0xff]  ;;  %v3667_v44 = vld [vmem:[#allocation24_spill] sm:$0xff]  ;;  %3668 = vst [vmem:[#allocation22_spill] sm:$0xff] %v3158_v45  ;;  %v3190_v40 = vld [vmem:[%s3445_s2 + $0x28] sm:$0xff] }
 0x245   :  { %v800_v34 = vmul.f32 %v778_v58, %v2765_v46  ;;  %v788_v31 = vmul.f32 %v1764_v52, %v787_v42  ;;  %v3131_v46 = vld [vmem:[%s3445_s2 + $0xd0] sm:$0xff]  ;;  %v3659_v42 = vld [vmem:[#allocation8_spill] sm:$0xff]  ;;  %3660 = vst [vmem:[#allocation23_spill] sm:$0xff] %v3140_v19  ;;  %v3171_v58 = vld [vmem:[%s3445_s2 + $0x48] sm:$0xff] }
 0x246   :  { %3656 = vst [vmem:[#allocation27_spill] sm:$0xff] %v3131_v46  ;;  %v3164_v41 = vld [vmem:[%s3445_s2 + $0x78] sm:$0xff]  ;;  %v3670_v56 = vld [vmem:[#allocation19_spill] sm:$0xff] }
 0x247   :  { %v3087_v54 = vadd.f32 %v801_v38, %v800_v34  ;;  %v789_v49 = vadd.f32 %v1764_v52, %v788_v31  ;;  %v3657_v34 = vld [vmem:[#allocation17_spill] sm:$0xff]  ;;  %v3658_v38 = vld [vmem:[#allocation12_spill] sm:$0xff]  ;;  %3669 = vst [vmem:[#allocation30_spill] sm:$0xff] %v3164_v41  ;;  %v3177_v31 = vld [vmem:[%s3445_s2 + $0x50] sm:$0xff] }
 0x248   :  { %3671 = vst [vmem:[#allocation26_spill] sm:$0xff] %v3171_v58 }
 0x249   :  { %1767 = vtanh.f32 %v3087_v54  ;;  %v793_v59 = vsel %vm792_vm3, %v1764_v52, %v789_v49  ;;  %v3661_v52 = vld [vmem:[#allocation11_spill] sm:$0xff]  ;;  %3672 = vst [vmem:[#allocation16_spill] sm:$0xff] %v3177_v31  ;;  %v3183_v49 = vld [vmem:[%s3445_s2 + $0x58] sm:$0xff] }
 0x24a   :  { %v798_v51 = vsel %vm795_vm4, %v797_v36, %v793_v59  ;;  %3673 = vst [vmem:[#allocation25_spill] sm:$0xff] %v3183_v49  ;;  %v3196_v59 = vld [vmem:[%s3445_s2 + $0x30] sm:$0xff]  ;;  %v3202_v36 = vld [vmem:[%s3445_s2 + $0x38] sm:$0xff] }
 0x24b   :  { %3675 = vst [vmem:[#allocation31_spill] sm:$0xff] %v3190_v40 }
 0x24c   :  { %3676 = vst [vmem:[#allocation29_spill] sm:$0xff] %v3196_v59 }
 0x24d   :  { %3677 = vst [vmem:[#allocation20_spill] sm:$0xff] %v3202_v36 }
 0x24f   :  { %v1768_v27 = vpop.eup %1767 }
 0x250   :  { %v804_v43 = vmul.f32 %v1768_v27, %v798_v51  ;;  %v3678_v27 = vld [vmem:[#allocation18_spill] sm:$0xff] }
 0x251   :  { %v3209_v51 = vld [vmem:[%s3445_s2 + $0x8] sm:$0xff] }
 0x252   :  { %828 = vmatmul.f32.vlgmr.msra.gmra.mxu0 %v804_v43  ;;  %848 = vmatmul.f32.vlgmr.msrb.gmra.mxu1 %v804_v43  ;;  %3679 = vst [vmem:[#allocation28_spill] sm:$0xff] %v3209_v51 }
 0x253   :  { %868 = vmatmul.f32.vlgmr.msrb.gmra.mxu2 %v804_v43  ;;  %888 = vmatmul.f32.vlgmr.msrb.gmra.mxu3 %v804_v43  ;;  %v3215_v43 = vld [vmem:[%s3445_s2 + $0x10] sm:$0xff] }
 0x254   :  { %1120 = vmatpush.msra.mxu0 %v2771_v1  ;;  %1140 = vmatpush.msrb.mxu1 %v2777_v60  ;;  %3680 = vst [vmem:[#allocation33_spill] sm:$0xff] %v3215_v43 }
 0x255   :  { %1160 = vmatpush.msrb.mxu2 %v2783_v62  ;;  %1180 = vmatpush.msrb.mxu3 %v2789_v3 }
 0x256   :  { %1121 = vmatpush.msra.mxu0 %v2795_v10  ;;  %1141 = vmatpush.msrb.mxu1 %v2801_v7 }
 0x257   :  { %1161 = vmatpush.msrb.mxu2 %v2807_v5  ;;  %1181 = vmatpush.msrb.mxu3 %v2813_v22 }
 0x258   :  { %1122 = vmatpush.msra.mxu0 %v2819_v48  ;;  %1142 = vmatpush.msrb.mxu1 %v2825_v13 }
 0x259   :  { %1162 = vmatpush.msrb.mxu2 %v2831_v8  ;;  %1182 = vmatpush.msrb.mxu3 %v2837_v6 }
 0x25a   :  { %1123 = vmatpush.msra.mxu0 %v2843_v12  ;;  %1143 = vmatpush.msrb.mxu1 %v2849_v20 }
 0x25b   :  { %1163 = vmatpush.msrb.mxu2 %v2855_v35  ;;  %1183 = vmatpush.msrb.mxu3 %v2861_v61 }
 0x25c   :  { %1124 = vmatpush.msra.mxu0 %v2867_v18  ;;  %1144 = vmatpush.msrb.mxu1 %v2873_v57 }
 0x25d   :  { %1164 = vmatpush.msrb.mxu2 %v2879_v0  ;;  %1184 = vmatpush.msrb.mxu3 %v2885_v11 }
 0x25e   :  { %1125 = vmatpush.msra.mxu0 %v2891_v63  ;;  %1145 = vmatpush.msrb.mxu1 %v2897_v14 }
 0x25f   :  { %1165 = vmatpush.msrb.mxu2 %v2903_v17  ;;  %1185 = vmatpush.msrb.mxu3 %v2909_v9 }
 0x260   :  { %1126 = vmatpush.msra.mxu0 %v2915_v15  ;;  %1146 = vmatpush.msrb.mxu1 %v2921_v21 }
 0x261   :  { %1166 = vmatpush.msrb.mxu2 %v2927_v23  ;;  %1186 = vmatpush.msrb.mxu3 %v2933_v4 }
 0x262   :  { %1127 = vmatpush.msra.mxu0 %v2939_v2  ;;  %1147 = vmatpush.msrb.mxu1 %v2945_v16 }
 0x263   :  { %1167 = vmatpush.msrb.mxu2 %v2951_v24  ;;  %1187 = vmatpush.msrb.mxu3 %v2957_v25 }
 0x264   :  { %1128 = vmatpush.msra.mxu0 %v2963_v26  ;;  %1148 = vmatpush.msrb.mxu1 %v2969_v28 }
 0x265   :  { %1168 = vmatpush.msrb.mxu2 %v2975_v29  ;;  %1188 = vmatpush.msrb.mxu3 %v2981_v30 }
 0x266   :  { %1129 = vmatpush.msra.mxu0 %v2987_v32  ;;  %1149 = vmatpush.msrb.mxu1 %v2993_v33 }
 0x267   :  { %1169 = vmatpush.msrb.mxu2 %v3131_v46  ;;  %1189 = vmatpush.msrb.mxu3 %v3657_v34 }
 0x268   :  { %1130 = vmatpush.msra.mxu0 %v3658_v38  ;;  %1150 = vmatpush.msrb.mxu1 %v3659_v42 }
 0x269   :  { %1170 = vmatpush.msrb.mxu2 %v3140_v19  ;;  %1190 = vmatpush.msrb.mxu3 %v3661_v52 }
 0x26a   :  { %1131 = vmatpush.msra.mxu0 %v3662_v37  ;;  %1151 = vmatpush.msrb.mxu1 %v3663_v47 }
 0x26b   :  { %1171 = vmatpush.msrb.mxu2 %v3149_v53  ;;  %1191 = vmatpush.msrb.mxu3 %v3665_v50 }
 0x26c   :  { %1132 = vmatpush.msra.mxu0 %v3666_v39  ;;  %1152 = vmatpush.msrb.mxu1 %v3667_v44 }
 0x26d   :  { %1172 = vmatpush.msrb.mxu2 %v3158_v45  ;;  %1192 = vmatpush.msrb.mxu3 %v3164_v41  ;;  %v3684_v41 = vld [vmem:[#allocation47_spill] sm:$0xff] }
 0x26e   :  { %1133 = vmatpush.msra.mxu0 %v3670_v56  ;;  %1153 = vmatpush.msrb.mxu1 %v3171_v58 }
 0x26f   :  { %1173 = vmatpush.msrb.mxu2 %v3177_v31  ;;  %1193 = vmatpush.msrb.mxu3 %v3183_v49  ;;  %v3683_v49 = vld [vmem:[#allocation45_spill] sm:$0xff] }
 0x270   :  { %1134 = vmatpush.msra.mxu0 %v3674_v55  ;;  %1154 = vmatpush.msrb.mxu1 %v3190_v40  ;;  %v3682_v40 = vld [vmem:[#allocation40_spill] sm:$0xff] }
 0x271   :  { %1174 = vmatpush.msrb.mxu2 %v3196_v59  ;;  %1194 = vmatpush.msrb.mxu3 %v3202_v36  ;;  %v3221_v36 = vld [vmem:[%s3445_s2 + $0x18] sm:$0xff] }
 0x272   :  { %1135 = vmatpush.msra.mxu0 %v3678_v27  ;;  %1155 = vmatpush.msrb.mxu1 %v3209_v51  ;;  %3681 = vst [vmem:[#allocation32_spill] sm:$0xff] %v3221_v36 }
 0x273   :  { %1175 = vmatpush.msrb.mxu2 %v3215_v43  ;;  %1195 = vmatpush.msrb.mxu3 %v3221_v36 }
 0x2cf   :  { %v829_v27 = vpop.f32.mrf.mxu0  ;;  %v849_v59 = vpop.f32.mrf.mxu1 }
 0x2d0   :  { %v892_v55 = vadd.f32 %v829_v27, %v3682_v40  ;;  %v893_v51 = vadd.f32 %v849_v59, %v3683_v49  ;;  %v3685_v49 = vld [vmem:[#allocation46_spill] sm:$0xff] }
 0x2d2   :  { %v1691_v31 = vmul.f32 -1.442695, %v892_v55  ;;  %v1692_v58 = vmul.f32 -1.442695, %v893_v51 }
 0x2d4   :  { %1769 = vpow2.f32 %v1691_v31 }
 0x2d5   :  { %1771 = vpow2.f32 %v1692_v58 }
 0x2d6   :  { %v889_v56 = vpop.f32.mrf.mxu3  ;;  %v869_v36 = vpop.f32.mrf.mxu2 }
 0x2d7   :  { %v895_v43 = vadd.f32 %v889_v56, %v3684_v41  ;;  %v894_v55 = vadd.f32 %v869_v36, %v3685_v49 }
 0x2d9   :  { %v1693_v45 = vmul.f32 -1.442695, %v895_v43 }
 0x2da   :  { %v1770_v44 = vpop.eup %1769 }
 0x2db   :  { %v1772_v39 = vpop.eup %1771  ;;  %v899_v50 = vadd.f32 1.0, %v1770_v44  ;;  %1773 = vpow2.f32 %v1693_v45 }
 0x2dc   :  { %v918_v53 = vadd.f32 1.0, %v1772_v39 }
 0x2dd   :  { %1775 = vrcp.f32 %v899_v50  ;;  %v911_v56 = vand.u32 2147483648, %v899_v50  ;;  %v909_v39 = vand.u32 2147483647, %v899_v50  ;;  %vm905_vm7 = vweird.f32 %v899_v50 }
 0x2de   :  { %1777 = vrcp.f32 %v918_v53  ;;  %v930_v43 = vand.u32 2147483648, %v918_v53  ;;  %v928_v37 = vand.u32 2147483647, %v918_v53  ;;  %vm924_vm8 = vweird.f32 %v918_v53 }
 0x2df   :  { %v912_v36 = vor.u32 1.1754944e-38, %v911_v56  ;;  %vm910_vm11 = vcmp.eq.f32.partialorder %v909_v39, 8.507059e+37 }
 0x2e0   :  { %vm929_vm12 = vcmp.eq.f32.partialorder %v928_v37, 8.507059e+37 }
 0x2e1   :  { %v1774_v47 = vpop.eup %1773 }
 0x2e2   :  { %v938_v40 = vadd.f32 1.0, %v1774_v47 }
 0x2e3   :  { %v1776_v27 = vpop.eup %1775 }
 0x2e4   :  { %v1778_v59 = vpop.eup %1777  ;;  %v901_v31 = vmul.f32 %v1776_v27, %v899_v50  ;;  %1779 = vrcp.f32 %v938_v40  ;;  %vm906_vm5 = vweird.f32 %v1776_v27  ;;  %v950_v56 = vand.u32 2147483648, %v938_v40 }
 0x2e5   :  { %v920_v58 = vmul.f32 %v1778_v59, %v918_v53  ;;  %1781 = vtanh.f32 %v894_v55  ;;  %vm925_vm6 = vweird.f32 %v1778_v59  ;;  %vm907_vm9 = vmor %vm905_vm7, %vm906_vm5  ;;  %vm944_vm14 = vweird.f32 %v938_v40 }
 0x2e6   :  { %v902_v51 = vsub.f32 1.0, %v901_v31  ;;  %vm926_vm10 = vmor %vm924_vm8, %vm925_vm6  ;;  %v931_v31 = vor.u32 1.1754944e-38, %v930_v43  ;;  %v951_v39 = vor.u32 1.1754944e-38, %v950_v56  ;;  %v3704_v56 = vld [vmem:[#allocation10_spill] sm:$0xff] }
 0x2e7   :  { %v921_v41 = vsub.f32 1.0, %v920_v58 }
 0x2e8   :  { %v903_v44 = vmul.f32 %v1776_v27, %v902_v51 }
 0x2e9   :  { %v922_v45 = vmul.f32 %v1778_v59, %v921_v41 }
 0x2ea   :  { %v1780_v52 = vpop.eup %1779  ;;  %v904_v47 = vadd.f32 %v1776_v27, %v903_v44 }
 0x2eb   :  { %v923_v49 = vadd.f32 %v1778_v59, %v922_v45  ;;  %v940_v19 = vmul.f32 %v1780_v52, %v938_v40  ;;  %v1782_v55 = vpop.eup %1781  ;;  %vm945_vm13 = vweird.f32 %v1780_v52  ;;  %v3693_v45 = vld [vmem:[#allocation15_spill] sm:$0xff] }
 0x2ec   :  { %v908_v58 = vsel %vm907_vm9, %v1776_v27, %v904_v47  ;;  %v948_v27 = vand.u32 2147483647, %v938_v40  ;;  %vm946_vm15 = vmor %vm944_vm14, %vm945_vm13  ;;  %v3692_v40 = vld [vmem:[#allocation21_spill] sm:$0xff] }
 0x2ed   :  { %v913_v42 = vsel %vm910_vm11, %v912_v36, %v908_v58  ;;  %v927_v51 = vsel %vm926_vm10, %v1778_v59, %v923_v49  ;;  %v941_v38 = vsub.f32 1.0, %v940_v19  ;;  %v3694_v47 = vld [vmem:[#allocation13_spill] sm:$0xff]  ;;  %v3696_v49 = vld [vmem:[#allocation14_spill] sm:$0xff] }
 0x2ee   :  { %v932_v41 = vsel %vm929_vm12, %v931_v31, %v927_v51  ;;  %v955_v34 = vmul.f32 %v1782_v55, %v913_v42  ;;  %vm949_vm0 = vcmp.eq.f32.partialorder %v948_v27, 8.507059e+37  ;;  %v3690_v42 = vld [vmem:[#allocation23_spill] sm:$0xff]  ;;  %v3695_v36 = vld [vmem:[#allocation9_spill] sm:$0xff]  ;;  %v3697_v31 = vld [vmem:[#allocation24_spill] sm:$0xff] }
 0x2ef   :  { %v954_v46 = vmul.f32 %v932_v41, %v3087_v54  ;;  %v942_v44 = vmul.f32 %v1780_v52, %v941_v38  ;;  %v3686_v54 = vld [vmem:[#allocation27_spill] sm:$0xff]  ;;  %v3689_v38 = vld [vmem:[#allocation8_spill] sm:$0xff]  ;;  %v3698_v58 = vld [vmem:[#allocation22_spill] sm:$0xff] }
 0x2f0   :  { %v3699_v55 = vld [vmem:[#allocation30_spill] sm:$0xff]  ;;  %v3700_v51 = vld [vmem:[#allocation19_spill] sm:$0xff] }
 0x2f1   :  { %v3229_v50 = vadd.f32 %v955_v34, %v954_v46  ;;  %v943_v53 = vadd.f32 %v1780_v52, %v942_v44  ;;  %v3687_v46 = vld [vmem:[#allocation17_spill] sm:$0xff]  ;;  %v3688_v34 = vld [vmem:[#allocation12_spill] sm:$0xff]  ;;  %v3701_v41 = vld [vmem:[#allocation26_spill] sm:$0xff] }
 0x2f2   :  { %v3702_v44 = vld [vmem:[#allocation16_spill] sm:$0xff]  ;;  %v3705_v27 = vld [vmem:[#allocation31_spill] sm:$0xff] }
 0x2f3   :  { %1783 = vtanh.f32 %v3229_v50  ;;  %v947_v43 = vsel %vm946_vm15, %v1780_v52, %v943_v53  ;;  %v3691_v52 = vld [vmem:[#allocation11_spill] sm:$0xff]  ;;  %v3703_v53 = vld [vmem:[#allocation25_spill] sm:$0xff] }
 0x2f4   :  { %v952_v19 = vsel %vm949_vm0, %v951_v39, %v947_v43  ;;  %v3706_v43 = vld [vmem:[#allocation29_spill] sm:$0xff]  ;;  %v3707_v39 = vld [vmem:[#allocation20_spill] sm:$0xff] }
 0x2f9   :  { %v1784_v37 = vpop.eup %1783 }
 0x2fa   :  { %v958_v59 = vmul.f32 %v1784_v37, %v952_v19  ;;  %v3708_v37 = vld [vmem:[#allocation18_spill] sm:$0xff]  ;;  %v3709_v19 = vld [vmem:[#allocation28_spill] sm:$0xff] }
 0x2fc   :  { %982 = vmatmul.f32.vlgmr.msrb.gmra.mxu0 %v958_v59  ;;  %1002 = vmatmul.f32.vlgmr.msra.gmra.mxu1 %v958_v59 }
 0x2fd   :  { %1022 = vmatmul.f32.vlgmr.msra.gmra.mxu2 %v958_v59  ;;  %1042 = vmatmul.f32.vlgmr.msra.gmra.mxu3 %v958_v59  ;;  %v3710_v59 = vld [vmem:[#allocation33_spill] sm:$0xff] }
 0x2fe   :  { %1274 = vmatpush.msrb.mxu0 %v2771_v1  ;;  %1294 = vmatpush.msra.mxu1 %v2777_v60 }
 0x2ff   :  { %1314 = vmatpush.msra.mxu2 %v2783_v62  ;;  %1334 = vmatpush.msra.mxu3 %v2789_v3 }
 0x300   :  { %1275 = vmatpush.msrb.mxu0 %v2795_v10  ;;  %1295 = vmatpush.msra.mxu1 %v2801_v7 }
 0x301   :  { %1315 = vmatpush.msra.mxu2 %v2807_v5  ;;  %1335 = vmatpush.msra.mxu3 %v2813_v22 }
 0x302   :  { %1276 = vmatpush.msrb.mxu0 %v2819_v48  ;;  %1296 = vmatpush.msra.mxu1 %v2825_v13 }
 0x303   :  { %1316 = vmatpush.msra.mxu2 %v2831_v8  ;;  %1336 = vmatpush.msra.mxu3 %v2837_v6 }
 0x304   :  { %1277 = vmatpush.msrb.mxu0 %v2843_v12  ;;  %1297 = vmatpush.msra.mxu1 %v2849_v20 }
 0x305   :  { %1317 = vmatpush.msra.mxu2 %v2855_v35  ;;  %1337 = vmatpush.msra.mxu3 %v2861_v61 }
 0x306   :  { %1278 = vmatpush.msrb.mxu0 %v2867_v18  ;;  %1298 = vmatpush.msra.mxu1 %v2873_v57 }
 0x307   :  { %1318 = vmatpush.msra.mxu2 %v2879_v0  ;;  %1338 = vmatpush.msra.mxu3 %v2885_v11 }
 0x308   :  { %1279 = vmatpush.msrb.mxu0 %v2891_v63  ;;  %1299 = vmatpush.msra.mxu1 %v2897_v14 }
 0x309   :  { %1319 = vmatpush.msra.mxu2 %v2903_v17  ;;  %1339 = vmatpush.msra.mxu3 %v2909_v9 }
 0x30a   :  { %1280 = vmatpush.msrb.mxu0 %v2915_v15  ;;  %1300 = vmatpush.msra.mxu1 %v2921_v21 }
 0x30b   :  { %1320 = vmatpush.msra.mxu2 %v2927_v23  ;;  %1340 = vmatpush.msra.mxu3 %v2933_v4 }
 0x30c   :  { %1281 = vmatpush.msrb.mxu0 %v2939_v2  ;;  %1301 = vmatpush.msra.mxu1 %v2945_v16 }
 0x30d   :  { %1321 = vmatpush.msra.mxu2 %v2951_v24  ;;  %1341 = vmatpush.msra.mxu3 %v2957_v25 }
 0x30e   :  { %1282 = vmatpush.msrb.mxu0 %v2963_v26  ;;  %1302 = vmatpush.msra.mxu1 %v2969_v28 }
 0x30f   :  { %1322 = vmatpush.msra.mxu2 %v2975_v29  ;;  %1342 = vmatpush.msra.mxu3 %v2981_v30 }
 0x310   :  { %1283 = vmatpush.msrb.mxu0 %v2987_v32  ;;  %1303 = vmatpush.msra.mxu1 %v2993_v33 }
 0x311   :  { %1323 = vmatpush.msra.mxu2 %v3686_v54  ;;  %1343 = vmatpush.msra.mxu3 %v3687_v46 }
 0x312   :  { %1284 = vmatpush.msrb.mxu0 %v3688_v34  ;;  %1304 = vmatpush.msra.mxu1 %v3689_v38 }
 0x313   :  { %1324 = vmatpush.msra.mxu2 %v3690_v42  ;;  %1344 = vmatpush.msra.mxu3 %v3691_v52 }
 0x314   :  { %1285 = vmatpush.msrb.mxu0 %v3692_v40  ;;  %1305 = vmatpush.msra.mxu1 %v3693_v45 }
 0x315   :  { %1325 = vmatpush.msra.mxu2 %v3694_v47  ;;  %1345 = vmatpush.msra.mxu3 %v3695_v36 }
 0x316   :  { %1286 = vmatpush.msrb.mxu0 %v3696_v49  ;;  %1306 = vmatpush.msra.mxu1 %v3697_v31 }
 0x317   :  { %1326 = vmatpush.msra.mxu2 %v3698_v58  ;;  %1346 = vmatpush.msra.mxu3 %v3699_v55  ;;  %v3712_v55 = vld [vmem:[#allocation44_spill] sm:$0xff] }
 0x318   :  { %1287 = vmatpush.msrb.mxu0 %v3700_v51  ;;  %1307 = vmatpush.msra.mxu1 %v3701_v41  ;;  %v3711_v51 = vld [vmem:[#allocation32_spill] sm:$0xff] }
 0x319   :  { %1327 = vmatpush.msra.mxu2 %v3702_v44  ;;  %1347 = vmatpush.msra.mxu3 %v3703_v53  ;;  %v3713_v58 = vld [vmem:[#allocation48_spill] sm:$0xff] }
 0x31a   :  { %1288 = vmatpush.msrb.mxu0 %v3704_v56  ;;  %1308 = vmatpush.msra.mxu1 %v3705_v27 }
 0x31b   :  { %1328 = vmatpush.msra.mxu2 %v3706_v43  ;;  %1348 = vmatpush.msra.mxu3 %v3707_v39  ;;  %v3714_v39 = vld [vmem:[#allocation50_spill] sm:$0xff] }
 0x31c   :  { %1289 = vmatpush.msrb.mxu0 %v3708_v37  ;;  %1309 = vmatpush.msra.mxu1 %v3709_v19 }
 0x31d   :  { %1329 = vmatpush.msra.mxu2 %v3710_v59  ;;  %1349 = vmatpush.msra.mxu3 %v3711_v51 }
 0x379   :  { %v983_v41 = vpop.f32.mrf.mxu0  ;;  %v1003_v44 = vpop.f32.mrf.mxu1 }
 0x37a   :  { %v1046_v53 = vadd.f32 %v983_v41, %v3712_v55  ;;  %v1047_v56 = vadd.f32 %v1003_v44, %v3713_v58  ;;  %v3715_v58 = vld [vmem:[#allocation49_spill] sm:$0xff] }
 0x37c   :  { %v1694_v31 = vmul.f32 -1.442695, %v1046_v53  ;;  %v1695_v27 = vmul.f32 -1.442695, %v1047_v56 }
 0x37e   :  { %1785 = vpow2.f32 %v1694_v31 }
 0x37f   :  { %1787 = vpow2.f32 %v1695_v27 }
 0x380   :  { %v1043_v43 = vpop.f32.mrf.mxu3  ;;  %v1023_v51 = vpop.f32.mrf.mxu2 }
 0x381   :  { %v1049_v49 = vadd.f32 %v1043_v43, %v3714_v39  ;;  %v1048_v44 = vadd.f32 %v1023_v51, %v3715_v58 }
 0x383   :  { %v1696_v37 = vmul.f32 -1.442695, %v1049_v49 }
 0x384   :  { %v1786_v36 = vpop.eup %1785 }
 0x385   :  { %v1788_v19 = vpop.eup %1787  ;;  %v1053_v47 = vadd.f32 1.0, %v1786_v36  ;;  %1789 = vpow2.f32 %v1696_v37 }
 0x386   :  { %v1072_v59 = vadd.f32 1.0, %v1788_v19 }
 0x387   :  { %1791 = vrcp.f32 %v1053_v47  ;;  %v1065_v49 = vand.u32 2147483648, %v1053_v47  ;;  %v1063_v37 = vand.u32 2147483647, %v1053_v47  ;;  %vm1059_vm3 = vweird.f32 %v1053_v47 }
 0x388   :  { %1793 = vrcp.f32 %v1072_v59  ;;  %v1084_v39 = vand.u32 2147483648, %v1072_v59  ;;  %v1082_v40 = vand.u32 2147483647, %v1072_v59  ;;  %vm1078_vm4 = vweird.f32 %v1072_v59 }
 0x389   :  { %v1066_v51 = vor.u32 1.1754944e-38, %v1065_v49  ;;  %vm1064_vm7 = vcmp.eq.f32.partialorder %v1063_v37, 8.507059e+37 }
 0x38a   :  { %vm1083_vm8 = vcmp.eq.f32.partialorder %v1082_v40, 8.507059e+37 }
 0x38b   :  { %v1790_v45 = vpop.eup %1789 }
 0x38c   :  { %v1092_v55 = vadd.f32 1.0, %v1790_v45 }
 0x38d   :  { %v1792_v41 = vpop.eup %1791 }
 0x38e   :  { %v1794_v53 = vpop.eup %1793  ;;  %v1055_v31 = vmul.f32 %v1792_v41, %v1053_v47  ;;  %1795 = vrcp.f32 %v1092_v55  ;;  %vm1060_vm1 = vweird.f32 %v1792_v41  ;;  %v1104_v49 = vand.u32 2147483648, %v1092_v55 }
 0x38f   :  { %v1074_v56 = vmul.f32 %v1794_v53, %v1072_v59  ;;  %1797 = vtanh.f32 %v1048_v44  ;;  %vm1079_vm2 = vweird.f32 %v1794_v53  ;;  %vm1061_vm5 = vmor %vm1059_vm3, %vm1060_vm1  ;;  %vm1098_vm10 = vweird.f32 %v1092_v55 }
 0x390   :  { %v1056_v27 = vsub.f32 1.0, %v1055_v31  ;;  %vm1080_vm6 = vmor %vm1078_vm4, %vm1079_vm2  ;;  %v1085_v31 = vor.u32 1.1754944e-38, %v1084_v39  ;;  %v1105_v37 = vor.u32 1.1754944e-38, %v1104_v49 }
 0x391   :  { %v1075_v43 = vsub.f32 1.0, %v1074_v56 }
 0x392   :  { %v1057_v36 = vmul.f32 %v1792_v41, %v1056_v27 }
 0x393   :  { %v1076_v19 = vmul.f32 %v1794_v53, %v1075_v43 }
 0x394   :  { %v1796_v52 = vpop.eup %1795  ;;  %v1058_v45 = vadd.f32 %v1792_v41, %v1057_v36 }
 0x395   :  { %v1077_v58 = vadd.f32 %v1794_v53, %v1076_v19  ;;  %v1094_v42 = vmul.f32 %v1796_v52, %v1092_v55  ;;  %v1798_v44 = vpop.eup %1797  ;;  %vm1099_vm9 = vweird.f32 %v1796_v52 }
 0x396   :  { %v1062_v56 = vsel %vm1061_vm5, %v1792_v41, %v1058_v45  ;;  %v1102_v41 = vand.u32 2147483647, %v1092_v55  ;;  %vm1100_vm11 = vmor %vm1098_vm10, %vm1099_vm9  ;;  %v3745_v45 = vld [vmem:[#allocation52_spill] sm:$0xff] }
 0x397   :  { %v1067_v38 = vsel %vm1064_vm7, %v1066_v51, %v1062_v56  ;;  %v1081_v27 = vsel %vm1080_vm6, %v1794_v53, %v1077_v58  ;;  %v1095_v34 = vsub.f32 1.0, %v1094_v42 }
 0x398   :  { %v1086_v43 = vsel %vm1083_vm8, %v1085_v31, %v1081_v27  ;;  %v1109_v46 = vmul.f32 %v1798_v44, %v1067_v38  ;;  %vm1103_vm12 = vcmp.eq.f32.partialorder %v1102_v41, 8.507059e+37 }
 0x399   :  { %v1108_v54 = vmul.f32 %v1086_v43, %v3229_v50  ;;  %v1096_v36 = vmul.f32 %v1796_v52, %v1095_v34 }
 0x39b   :  { %v3301_v47 = vadd.f32 %v1109_v46, %v1108_v54  ;;  %v1097_v59 = vadd.f32 %v1796_v52, %v1096_v36 }
 0x39d   :  { %1799 = vtanh.f32 %v3301_v47  ;;  %v1101_v39 = vsel %vm1100_vm11, %v1796_v52, %v1097_v59 }
 0x39e   :  { %v1106_v42 = vsel %vm1103_vm12, %v1105_v37, %v1101_v39 }
 0x3a3   :  { %v1800_v40 = vpop.eup %1799 }
 0x3a4   :  { %v1112_v53 = vmul.f32 %v1800_v40, %v1106_v42 }
 0x3a6   :  { %1136 = vmatmul.f32.vlgmr.msra.gmra.mxu0 %v1112_v53  ;;  %1156 = vmatmul.f32.vlgmr.msrb.gmra.mxu1 %v1112_v53 }
 0x3a7   :  { %1176 = vmatmul.f32.vlgmr.msrb.gmra.mxu2 %v1112_v53  ;;  %1196 = vmatmul.f32.vlgmr.msrb.gmra.mxu3 %v1112_v53 }
 0x3a8   :  { %1428 = vmatpush.msra.mxu0 %v2771_v1  ;;  %1448 = vmatpush.msrb.mxu1 %v2777_v60  ;;  %v3716_v1 = vld [vmem:[#allocation27_spill] sm:$0xff]  ;;  %v3717_v60 = vld [vmem:[#allocation17_spill] sm:$0xff] }
 0x3a9   :  { %1468 = vmatpush.msrb.mxu2 %v2783_v62  ;;  %1488 = vmatpush.msrb.mxu3 %v2789_v3  ;;  %v3718_v62 = vld [vmem:[#allocation12_spill] sm:$0xff] }
 0x3aa   :  { %1429 = vmatpush.msra.mxu0 %v2795_v10  ;;  %1449 = vmatpush.msrb.mxu1 %v2801_v7  ;;  %v3719_v3 = vld [vmem:[#allocation8_spill] sm:$0xff]  ;;  %v3720_v10 = vld [vmem:[#allocation23_spill] sm:$0xff] }
 0x3ab   :  { %1469 = vmatpush.msrb.mxu2 %v2807_v5  ;;  %1489 = vmatpush.msrb.mxu3 %v2813_v22  ;;  %v3721_v7 = vld [vmem:[#allocation11_spill] sm:$0xff]  ;;  %v3722_v5 = vld [vmem:[#allocation21_spill] sm:$0xff] }
 0x3ac   :  { %1430 = vmatpush.msra.mxu0 %v2819_v48  ;;  %1450 = vmatpush.msrb.mxu1 %v2825_v13  ;;  %v3723_v22 = vld [vmem:[#allocation15_spill] sm:$0xff]  ;;  %v3724_v48 = vld [vmem:[#allocation13_spill] sm:$0xff] }
 0x3ad   :  { %1470 = vmatpush.msrb.mxu2 %v2831_v8  ;;  %1490 = vmatpush.msrb.mxu3 %v2837_v6  ;;  %v3725_v13 = vld [vmem:[#allocation9_spill] sm:$0xff]  ;;  %v3726_v8 = vld [vmem:[#allocation14_spill] sm:$0xff]  ;;  %v3727_v6 = vld [vmem:[#allocation24_spill] sm:$0xff] }
 0x3ae   :  { %1431 = vmatpush.msra.mxu0 %v2843_v12  ;;  %1451 = vmatpush.msrb.mxu1 %v2849_v20  ;;  %v3728_v12 = vld [vmem:[#allocation22_spill] sm:$0xff] }
 0x3af   :  { %1471 = vmatpush.msrb.mxu2 %v2855_v35  ;;  %1491 = vmatpush.msrb.mxu3 %v2861_v61  ;;  %v3729_v20 = vld [vmem:[#allocation30_spill] sm:$0xff]  ;;  %v3730_v35 = vld [vmem:[#allocation19_spill] sm:$0xff] }
 0x3b0   :  { %1432 = vmatpush.msra.mxu0 %v2867_v18  ;;  %1452 = vmatpush.msrb.mxu1 %v2873_v57  ;;  %v3731_v61 = vld [vmem:[#allocation26_spill] sm:$0xff]  ;;  %v3732_v18 = vld [vmem:[#allocation16_spill] sm:$0xff]  ;;  %v3733_v57 = vld [vmem:[#allocation25_spill] sm:$0xff] }
 0x3b1   :  { %1472 = vmatpush.msrb.mxu2 %v2879_v0  ;;  %1492 = vmatpush.msrb.mxu3 %v2885_v11  ;;  %v3734_v0 = vld [vmem:[#allocation10_spill] sm:$0xff]  ;;  %v3735_v11 = vld [vmem:[#allocation31_spill] sm:$0xff] }
 0x3b2   :  { %1433 = vmatpush.msra.mxu0 %v2891_v63  ;;  %1453 = vmatpush.msrb.mxu1 %v2897_v14  ;;  %v3736_v63 = vld [vmem:[#allocation29_spill] sm:$0xff]  ;;  %v3737_v14 = vld [vmem:[#allocation20_spill] sm:$0xff] }
 0x3b3   :  { %1473 = vmatpush.msrb.mxu2 %v2903_v17  ;;  %1493 = vmatpush.msrb.mxu3 %v2909_v9  ;;  %v3738_v17 = vld [vmem:[#allocation18_spill] sm:$0xff]  ;;  %v3739_v9 = vld [vmem:[#allocation28_spill] sm:$0xff] }
 0x3b4   :  { %1434 = vmatpush.msra.mxu0 %v2915_v15  ;;  %1454 = vmatpush.msrb.mxu1 %v2921_v21  ;;  %v3740_v15 = vld [vmem:[#allocation33_spill] sm:$0xff]  ;;  %v3741_v21 = vld [vmem:[#allocation32_spill] sm:$0xff] }
 0x3b5   :  { %1474 = vmatpush.msrb.mxu2 %v2927_v23  ;;  %1494 = vmatpush.msrb.mxu3 %v2933_v4 }
 0x3b6   :  { %1435 = vmatpush.msra.mxu0 %v2939_v2  ;;  %1455 = vmatpush.msrb.mxu1 %v2945_v16  ;;  %v3742_v2 = vld [vmem:[#allocation6_spill] sm:$0xff] }
 0x3b7   :  { %1475 = vmatpush.msrb.mxu2 %v2951_v24  ;;  %1495 = vmatpush.msrb.mxu3 %v2957_v25  ;;  %v3743_v24 = vld [vmem:[#allocation51_spill] sm:$0xff] }
 0x3b8   :  { %1436 = vmatpush.msra.mxu0 %v2963_v26  ;;  %1456 = vmatpush.msrb.mxu1 %v2969_v28 }
 0x3b9   :  { %1476 = vmatpush.msrb.mxu2 %v2975_v29  ;;  %1496 = vmatpush.msrb.mxu3 %v2981_v30  ;;  %v3744_v30 = vld [vmem:[#allocation53_spill] sm:$0xff] }
 0x3ba   :  { %1437 = vmatpush.msra.mxu0 %v2987_v32  ;;  %1457 = vmatpush.msrb.mxu1 %v2993_v33 }
 0x3bb   :  { %1477 = vmatpush.msrb.mxu2 %v3716_v1  ;;  %1497 = vmatpush.msrb.mxu3 %v3717_v60 }
 0x3bc   :  { %1438 = vmatpush.msra.mxu0 %v3718_v62  ;;  %1458 = vmatpush.msrb.mxu1 %v3719_v3 }
 0x3bd   :  { %1478 = vmatpush.msrb.mxu2 %v3720_v10  ;;  %1498 = vmatpush.msrb.mxu3 %v3721_v7 }
 0x3be   :  { %1439 = vmatpush.msra.mxu0 %v3722_v5  ;;  %1459 = vmatpush.msrb.mxu1 %v3723_v22 }
 0x3bf   :  { %1479 = vmatpush.msrb.mxu2 %v3724_v48  ;;  %1499 = vmatpush.msrb.mxu3 %v3725_v13 }
 0x3c0   :  { %1440 = vmatpush.msra.mxu0 %v3726_v8  ;;  %1460 = vmatpush.msrb.mxu1 %v3727_v6 }
 0x3c1   :  { %1480 = vmatpush.msrb.mxu2 %v3728_v12  ;;  %1500 = vmatpush.msrb.mxu3 %v3729_v20 }
 0x3c2   :  { %1441 = vmatpush.msra.mxu0 %v3730_v35  ;;  %1461 = vmatpush.msrb.mxu1 %v3731_v61 }
 0x3c3   :  { %1481 = vmatpush.msrb.mxu2 %v3732_v18  ;;  %1501 = vmatpush.msrb.mxu3 %v3733_v57 }
 0x3c4   :  { %1442 = vmatpush.msra.mxu0 %v3734_v0  ;;  %1462 = vmatpush.msrb.mxu1 %v3735_v11 }
 0x3c5   :  { %1482 = vmatpush.msrb.mxu2 %v3736_v63  ;;  %1502 = vmatpush.msrb.mxu3 %v3737_v14  ;;  %v3746_v14 = vld [vmem:[#allocation7_spill] sm:$0xff] }
 0x3c6   :  { %1443 = vmatpush.msra.mxu0 %v3738_v17  ;;  %1463 = vmatpush.msrb.mxu1 %v3739_v9  ;;  %v3747_v9 = vld [vmem:[#allocation54_spill] sm:$0xff] }
 0x3c7   :  { %1483 = vmatpush.msrb.mxu2 %v3740_v15  ;;  %1503 = vmatpush.msrb.mxu3 %v3741_v21 }
 0x423   :  { %v1137_v23 = vpop.f32.mrf.mxu0  ;;  %v1157_v4 = vpop.f32.mrf.mxu1 }
 0x424   :  { %v1200_v16 = vadd.f32 %v1137_v23, %v3742_v2  ;;  %v1201_v25 = vadd.f32 %v1157_v4, %v3743_v24  ;;  %v3748_v2 = vld [vmem:[#allocation56_spill] sm:$0xff] }
 0x426   :  { %v1697_v26 = vmul.f32 -1.442695, %v1200_v16  ;;  %v1698_v28 = vmul.f32 -1.442695, %v1201_v25 }
 0x428   :  { %1801 = vpow2.f32 %v1697_v26 }
 0x429   :  { %1803 = vpow2.f32 %v1698_v28 }
 0x42a   :  { %v1197_v29 = vpop.f32.mrf.mxu3  ;;  %v1177_v38 = vpop.f32.mrf.mxu2 }
 0x42b   :  { %v1203_v32 = vadd.f32 %v1197_v29, %v3744_v30  ;;  %v1202_v51 = vadd.f32 %v1177_v38, %v3745_v45 }
 0x42d   :  { %v1699_v33 = vmul.f32 -1.442695, %v1203_v32 }
 0x42e   :  { %v1802_v50 = vpop.eup %1801 }
 0x42f   :  { %v1804_v54 = vpop.eup %1803  ;;  %v1207_v46 = vadd.f32 1.0, %v1802_v50  ;;  %1805 = vpow2.f32 %v1699_v33 }
 0x430   :  { %v1226_v34 = vadd.f32 1.0, %v1804_v54  ;;  %v3749_v54 = vld [vmem:[#allocation55_spill] sm:$0xff] }
 0x431   :  { %1807 = vrcp.f32 %v1207_v46  ;;  %v1219_v43 = vand.u32 2147483648, %v1207_v46  ;;  %v1217_v49 = vand.u32 2147483647, %v1207_v46  ;;  %vm1213_vm15 = vweird.f32 %v1207_v46 }
 0x432   :  { %1809 = vrcp.f32 %v1226_v34  ;;  %v1238_v36 = vand.u32 2147483648, %v1226_v34  ;;  %v1236_v39 = vand.u32 2147483647, %v1226_v34  ;;  %vm1232_vm0 = vweird.f32 %v1226_v34 }
 0x433   :  { %v1220_v42 = vor.u32 1.1754944e-38, %v1219_v43  ;;  %vm1218_vm3 = vcmp.eq.f32.partialorder %v1217_v49, 8.507059e+37 }
 0x434   :  { %v1239_v60 = vor.u32 1.1754944e-38, %v1238_v36  ;;  %vm1237_vm4 = vcmp.eq.f32.partialorder %v1236_v39, 8.507059e+37 }
 0x435   :  { %v1806_v52 = vpop.eup %1805 }
 0x436   :  { %v1246_v55 = vadd.f32 1.0, %v1806_v52 }
 0x437   :  { %v1808_v19 = vpop.eup %1807 }
 0x438   :  { %v1810_v58 = vpop.eup %1809  ;;  %v1209_v31 = vmul.f32 %v1808_v19, %v1207_v46  ;;  %1811 = vrcp.f32 %v1246_v55  ;;  %vm1214_vm13 = vweird.f32 %v1808_v19  ;;  %v1258_v20 = vand.u32 2147483648, %v1246_v55 }
 0x439   :  { %v1228_v56 = vmul.f32 %v1810_v58, %v1226_v34  ;;  %1813 = vtanh.f32 %v1202_v51  ;;  %vm1233_vm14 = vweird.f32 %v1810_v58  ;;  %vm1215_vm1 = vmor %vm1213_vm15, %vm1214_vm13  ;;  %vm1252_vm6 = vweird.f32 %v1246_v55 }
 0x43a   :  { %v1210_v44 = vsub.f32 1.0, %v1209_v31  ;;  %vm1234_vm2 = vmor %vm1232_vm0, %vm1233_vm14  ;;  %v1256_v35 = vand.u32 2147483647, %v1246_v55  ;;  %v1259_v18 = vor.u32 1.1754944e-38, %v1258_v20 }
 0x43b   :  { %v1229_v27 = vsub.f32 1.0, %v1228_v56 }
 0x43c   :  { %v1211_v59 = vmul.f32 %v1808_v19, %v1210_v44  ;;  %vm1257_vm8 = vcmp.eq.f32.partialorder %v1256_v35, 8.507059e+37  ;;  %v1589_v35 = vld [vmem:[%s3447_s4 + $0x70] sm:$0xff] }
 0x43d   :  { %v1230_v41 = vmul.f32 %v1810_v58, %v1229_v27 }
 0x43e   :  { %v1812_v37 = vpop.eup %1811  ;;  %v1212_v40 = vadd.f32 %v1808_v19, %v1211_v59 }
 0x43f   :  { %v1231_v53 = vadd.f32 %v1810_v58, %v1230_v41  ;;  %v1248_v1 = vmul.f32 %v1812_v37, %v1246_v55  ;;  %v1814_v3 = vpop.eup %1813  ;;  %vm1253_vm5 = vweird.f32 %v1812_v37 }
 0x440   :  { %v1216_v62 = vsel %vm1215_vm1, %v1808_v19, %v1212_v40  ;;  %vm1254_vm7 = vmor %vm1252_vm6, %vm1253_vm5 }
 0x441   :  { %v1221_v10 = vsel %vm1218_vm3, %v1220_v42, %v1216_v62  ;;  %v1235_v7 = vsel %vm1234_vm2, %v1810_v58, %v1231_v53  ;;  %v1249_v5 = vsub.f32 1.0, %v1248_v1 }
 0x442   :  { %v1240_v22 = vsel %vm1237_vm4, %v1239_v60, %v1235_v7  ;;  %v1263_v48 = vmul.f32 %v1814_v3, %v1221_v10 }
 0x443   :  { %v1262_v13 = vmul.f32 %v1240_v22, %v3301_v47  ;;  %v1250_v8 = vmul.f32 %v1812_v37, %v1249_v5 }
 0x445   :  { %v3373_v6 = vadd.f32 %v1263_v48, %v1262_v13  ;;  %v1251_v12 = vadd.f32 %v1812_v37, %v1250_v8 }
 0x447   :  { %1815 = vtanh.f32 %v3373_v6  ;;  %v1255_v61 = vsel %vm1254_vm7, %v1812_v37, %v1251_v12 }
 0x448   :  { %v1260_v0 = vsel %vm1257_vm8, %v1259_v18, %v1255_v61  ;;  %v1588_v61 = vld [vmem:[%s3447_s4 + $0x68] sm:$0xff]  ;;  %v1587_v18 = vld [vmem:[%s3447_s4 + $0x60] sm:$0xff] }
 0x44d   :  { %v1816_v57 = vpop.eup %1815 }
 0x44e   :  { %v1266_v11 = vmul.f32 %v1816_v57, %v1260_v0  ;;  %v1586_v57 = vld [vmem:[%s3447_s4 + $0x58] sm:$0xff]  ;;  %v1585_v0 = vld [vmem:[%s3447_s4 + $0x50] sm:$0xff] }
 0x450   :  { %1290 = vmatmul.f32.vlgmr.msrb.gmra.mxu0 %v1266_v11  ;;  %1310 = vmatmul.f32.vlgmr.msra.gmra.mxu1 %v1266_v11 }
 0x451   :  { %1330 = vmatmul.f32.vlgmr.msra.gmra.mxu2 %v1266_v11  ;;  %1350 = vmatmul.f32.vlgmr.msra.gmra.mxu3 %v1266_v11  ;;  %v1584_v11 = vld [vmem:[%s3447_s4 + $0x48] sm:$0xff] }
 0x4cd   :  { %v1291_v47 = vpop.f32.mrf.mxu0  ;;  %v1311_v63 = vpop.f32.mrf.mxu1 }
 0x4ce   :  { %v1354_v17 = vadd.f32 %v1291_v47, %v3746_v14  ;;  %v1355_v15 = vadd.f32 %v1311_v63, %v3747_v9  ;;  %v1583_v47 = vld [vmem:[%s3447_s4 + $0x40] sm:$0xff]  ;;  %v1582_v63 = vld [vmem:[%s3447_s4 + $0x38] sm:$0xff]  ;;  %v1581_v14 = vld [vmem:[%s3447_s4 + $0x30] sm:$0xff] }
 0x4d0   :  { %v1700_v21 = vmul.f32 -1.442695, %v1354_v17  ;;  %v1701_v23 = vmul.f32 -1.442695, %v1355_v15  ;;  %v3750_v15 = vld [vmem:[#allocation34_spill] sm:$0xff] }
 0x4d2   :  { %1817 = vpow2.f32 %v1700_v21 }
 0x4d3   :  { %1819 = vpow2.f32 %v1701_v23  ;;  %v3751_v23 = vld [vmem:[#allocation57_spill] sm:$0xff] }
 0x4d4   :  { %v1351_v4 = vpop.f32.mrf.mxu3  ;;  %v1331_v30 = vpop.f32.mrf.mxu2 }
 0x4d5   :  { %v1357_v16 = vadd.f32 %v1351_v4, %v3748_v2  ;;  %v1356_v46 = vadd.f32 %v1331_v30, %v3749_v54  ;;  %v1580_v2 = vld [vmem:[%s3447_s4 + $0x28] sm:$0xff] }
 0x4d6   :  { %v1576_v30 = vld [vmem:[%s3447_s4 + $0x8] sm:$0xff] }
 0x4d7   :  { %v1702_v24 = vmul.f32 -1.442695, %v1357_v16 }
 0x4d8   :  { %v1818_v25 = vpop.eup %1817 }
 0x4d9   :  { %v1820_v26 = vpop.eup %1819  ;;  %v1361_v28 = vadd.f32 1.0, %v1818_v25  ;;  %1821 = vpow2.f32 %v1702_v24  ;;  %v1579_v25 = vld [vmem:[%s3447_s4 + $0x20] sm:$0xff] }
 0x4da   :  { %v1380_v29 = vadd.f32 1.0, %v1820_v26  ;;  %v1578_v26 = vld [vmem:[%s3447_s4 + $0x18] sm:$0xff] }
 0x4db   :  { %1823 = vrcp.f32 %v1361_v28  ;;  %v1373_v45 = vand.u32 2147483648, %v1361_v28  ;;  %v1371_v31 = vand.u32 2147483647, %v1361_v28  ;;  %vm1367_vm11 = vweird.f32 %v1361_v28 }
 0x4dc   :  { %1825 = vrcp.f32 %v1380_v29  ;;  %v1392_v51 = vand.u32 2147483648, %v1380_v29  ;;  %v1390_v44 = vand.u32 2147483647, %v1380_v29  ;;  %vm1386_vm12 = vweird.f32 %v1380_v29 }
 0x4dd   :  { %v1374_v36 = vor.u32 1.1754944e-38, %v1373_v45  ;;  %vm1372_vm15 = vcmp.eq.f32.partialorder %v1371_v31, 8.507059e+37 }
 0x4de   :  { %v1393_v41 = vor.u32 1.1754944e-38, %v1392_v51  ;;  %vm1391_vm0 = vcmp.eq.f32.partialorder %v1390_v44, 8.507059e+37 }
 0x4df   :  { %v1822_v32 = vpop.eup %1821 }
 0x4e0   :  { %v1400_v33 = vadd.f32 1.0, %v1822_v32  ;;  %v3752_v32 = vld [vmem:[#allocation59_spill] sm:$0xff] }
 0x4e1   :  { %v1824_v50 = vpop.eup %1823 }
 0x4e2   :  { %v1826_v34 = vpop.eup %1825  ;;  %v1363_v38 = vmul.f32 %v1824_v50, %v1361_v28  ;;  %1827 = vrcp.f32 %v1400_v33  ;;  %vm1368_vm9 = vweird.f32 %v1824_v50  ;;  %v1412_v5 = vand.u32 2147483648, %v1400_v33  ;;  %v1577_v28 = vld [vmem:[%s3447_s4 + $0x10] sm:$0xff] }
 0x4e3   :  { %v1382_v52 = vmul.f32 %v1826_v34, %v1380_v29  ;;  %1829 = vtanh.f32 %v1356_v46  ;;  %vm1387_vm10 = vweird.f32 %v1826_v34  ;;  %vm1369_vm13 = vmor %vm1367_vm11, %vm1368_vm9  ;;  %vm1406_vm2 = vweird.f32 %v1400_v33 }
 0x4e4   :  { %v1364_v55 = vsub.f32 1.0, %v1363_v38  ;;  %vm1388_vm14 = vmor %vm1386_vm12, %vm1387_vm10  ;;  %v1410_v22 = vand.u32 2147483647, %v1400_v33  ;;  %v1413_v13 = vor.u32 1.1754944e-38, %v1412_v5 }
 0x4e5   :  { %v1383_v19 = vsub.f32 1.0, %v1382_v52 }
 0x4e6   :  { %v1365_v58 = vmul.f32 %v1824_v50, %v1364_v55  ;;  %vm1411_vm4 = vcmp.eq.f32.partialorder %v1410_v22, 8.507059e+37 }
 0x4e7   :  { %v1384_v56 = vmul.f32 %v1826_v34, %v1383_v19 }
 0x4e8   :  { %v1828_v27 = vpop.eup %1827  ;;  %v1366_v43 = vadd.f32 %v1824_v50, %v1365_v58  ;;  %v3753_v58 = vld [vmem:[#allocation58_spill] sm:$0xff] }
 0x4e9   :  { %v1385_v59 = vadd.f32 %v1826_v34, %v1384_v56  ;;  %v1402_v49 = vmul.f32 %v1828_v27, %v1400_v33  ;;  %v1830_v37 = vpop.eup %1829  ;;  %vm1407_vm1 = vweird.f32 %v1828_v27 }
 0x4ea   :  { %v1370_v39 = vsel %vm1369_vm13, %v1824_v50, %v1366_v43  ;;  %vm1408_vm3 = vmor %vm1406_vm2, %vm1407_vm1  ;;  %v1575_v50 = vld [vmem:[%s3447_s4] sm:$0xff] }
 0x4eb   :  { %v1375_v40 = vsel %vm1372_vm15, %v1374_v36, %v1370_v39  ;;  %v1389_v42 = vsel %vm1388_vm14, %v1826_v34, %v1385_v59  ;;  %v1403_v53 = vsub.f32 1.0, %v1402_v49 }
 0x4ec   :  { %v1394_v1 = vsel %vm1391_vm0, %v1393_v41, %v1389_v42  ;;  %v1417_v60 = vmul.f32 %v1830_v37, %v1375_v40 }
 0x4ed   :  { %v1416_v62 = vmul.f32 %v1394_v1, %v3373_v6  ;;  %v1404_v3 = vmul.f32 %v1828_v27, %v1403_v53  ;;  %v1590_v6 = vld [vmem:[%s3447_s4 + $0x78] sm:$0xff] }
 0x4ee   :  { %1595 = vmatpush.msrb.mxu0 %v1590_v6 }
 0x4ef   :  { %v3381_v10 = vadd.f32 %v1417_v60, %v1416_v62  ;;  %v1405_v7 = vadd.f32 %v1828_v27, %v1404_v3 }
 0x4f0   :  { %1596 = vmatpush.msrb.mxu0 %v1589_v35 }
 0x4f1   :  { %1831 = vtanh.f32 %v3381_v10  ;;  %v1409_v48 = vsel %vm1408_vm3, %v1828_v27, %v1405_v7 }
 0x4f2   :  { %v1414_v12 = vsel %vm1411_vm4, %v1413_v13, %v1409_v48  ;;  %1597 = vmatpush.msrb.mxu0 %v1588_v61 }
 0x4f4   :  { %1598 = vmatpush.msrb.mxu0 %v1587_v18 }
 0x4f6   :  { %1599 = vmatpush.msrb.mxu0 %v1586_v57 }
 0x4f7   :  { %v1832_v8 = vpop.eup %1831 }
 0x4f8   :  { %v1420_v20 = vmul.f32 %v1832_v8, %v1414_v12  ;;  %1600 = vmatpush.msrb.mxu0 %v1585_v0 }
 0x4fa   :  { %1444 = vmatmul.f32.vlgmr.msra.gmra.mxu0 %v1420_v20  ;;  %1464 = vmatmul.f32.vlgmr.msrb.gmra.mxu1 %v1420_v20 }
 0x4fb   :  { %1484 = vmatmul.f32.vlgmr.msrb.gmra.mxu2 %v1420_v20  ;;  %1504 = vmatmul.f32.vlgmr.msrb.gmra.mxu3 %v1420_v20 }
 0x4fc   :  { %1601 = vmatpush.msrb.mxu0 %v1584_v11 }
 0x4fe   :  { %1602 = vmatpush.msrb.mxu0 %v1583_v47 }
 0x500   :  { %1603 = vmatpush.msrb.mxu0 %v1582_v63 }
 0x502   :  { %1604 = vmatpush.msrb.mxu0 %v1581_v14 }
 0x504   :  { %1605 = vmatpush.msrb.mxu0 %v1580_v2 }
 0x506   :  { %1606 = vmatpush.msrb.mxu0 %v1579_v25 }
 0x508   :  { %1607 = vmatpush.msrb.mxu0 %v1578_v26 }
 0x50a   :  { %1608 = vmatpush.msrb.mxu0 %v1577_v28 }
 0x50c   :  { %1609 = vmatpush.msrb.mxu0 %v1576_v30 }
 0x50e   :  { %1610 = vmatpush.msrb.mxu0 %v1575_v50 }
 0x577   :  { %v1445_v17 = vpop.f32.mrf.mxu0  ;;  %v1465_v9 = vpop.f32.mrf.mxu1 }
 0x578   :  { %v1508_v21 = vadd.f32 %v1445_v17, %v3750_v15  ;;  %v1509_v4 = vadd.f32 %v1465_v9, %v3751_v23 }
 0x57a   :  { %v1703_v16 = vmul.f32 -1.442695, %v1508_v21  ;;  %v1704_v24 = vmul.f32 -1.442695, %v1509_v4 }
 0x57c   :  { %1833 = vpow2.f32 %v1703_v16 }
 0x57d   :  { %1835 = vpow2.f32 %v1704_v24 }
 0x57e   :  { %v1505_v29 = vpop.f32.mrf.mxu3  ;;  %v1485_v55 = vpop.f32.mrf.mxu2 }
 0x57f   :  { %v1511_v33 = vadd.f32 %v1505_v29, %v3752_v32  ;;  %v1510_v31 = vadd.f32 %v1485_v55, %v3753_v58 }
 0x581   :  { %v1705_v54 = vmul.f32 -1.442695, %v1511_v33 }
 0x582   :  { %v1834_v46 = vpop.eup %1833 }
 0x583   :  { %v1836_v34 = vpop.eup %1835  ;;  %v1515_v38 = vadd.f32 1.0, %v1834_v46  ;;  %1837 = vpow2.f32 %v1705_v54 }
 0x584   :  { %v1534_v52 = vadd.f32 1.0, %v1836_v34 }
 0x585   :  { %1839 = vrcp.f32 %v1515_v38  ;;  %v1527_v59 = vand.u32 2147483648, %v1515_v38  ;;  %v1525_v39 = vand.u32 2147483647, %v1515_v38  ;;  %vm1521_vm7 = vweird.f32 %v1515_v38 }
 0x586   :  { %1841 = vrcp.f32 %v1534_v52  ;;  %v1546_v49 = vand.u32 2147483648, %v1534_v52  ;;  %v1544_v40 = vand.u32 2147483647, %v1534_v52  ;;  %vm1540_vm8 = vweird.f32 %v1534_v52 }
 0x587   :  { %v1528_v1 = vor.u32 1.1754944e-38, %v1527_v59  ;;  %vm1526_vm11 = vcmp.eq.f32.partialorder %v1525_v39, 8.507059e+37 }
 0x588   :  { %v1547_v3 = vor.u32 1.1754944e-38, %v1546_v49  ;;  %vm1545_vm12 = vcmp.eq.f32.partialorder %v1544_v40, 8.507059e+37 }
 0x589   :  { %v1838_v19 = vpop.eup %1837 }
 0x58a   :  { %v1554_v45 = vadd.f32 1.0, %v1838_v19 }
 0x58b   :  { %v1840_v51 = vpop.eup %1839 }
 0x58c   :  { %v1842_v56 = vpop.eup %1841  ;;  %v1517_v44 = vmul.f32 %v1840_v51, %v1515_v38  ;;  %1843 = vrcp.f32 %v1554_v45  ;;  %vm1522_vm5 = vweird.f32 %v1840_v51  ;;  %v1566_v18 = vand.u32 2147483648, %v1554_v45 }
 0x58d   :  { %v1536_v27 = vmul.f32 %v1842_v56, %v1534_v52  ;;  %1845 = vtanh.f32 %v1510_v31  ;;  %vm1541_vm6 = vweird.f32 %v1842_v56  ;;  %vm1523_vm9 = vmor %vm1521_vm7, %vm1522_vm5  ;;  %vm1560_vm14 = vweird.f32 %v1554_v45 }
 0x58e   :  { %v1518_v43 = vsub.f32 1.0, %v1517_v44  ;;  %vm1542_vm10 = vmor %vm1540_vm8, %vm1541_vm6  ;;  %v1564_v57 = vand.u32 2147483647, %v1554_v45  ;;  %v1567_v11 = vor.u32 1.1754944e-38, %v1566_v18 }
 0x58f   :  { %v1537_v36 = vsub.f32 1.0, %v1536_v27 }
 0x590   :  { %v1519_v41 = vmul.f32 %v1840_v51, %v1518_v43  ;;  %vm1565_vm0 = vcmp.eq.f32.partialorder %v1564_v57, 8.507059e+37 }
 0x591   :  { %v1538_v37 = vmul.f32 %v1842_v56, %v1537_v36 }
 0x592   :  { %v1844_v42 = vpop.eup %1843  ;;  %v1520_v53 = vadd.f32 %v1840_v51, %v1519_v41 }
 0x593   :  { %v1539_v60 = vadd.f32 %v1842_v56, %v1538_v37  ;;  %v1556_v62 = vmul.f32 %v1844_v42, %v1554_v45  ;;  %v1846_v5 = vpop.eup %1845  ;;  %vm1561_vm13 = vweird.f32 %v1844_v42 }
 0x594   :  { %v1524_v7 = vsel %vm1523_vm9, %v1840_v51, %v1520_v53  ;;  %vm1562_vm15 = vmor %vm1560_vm14, %vm1561_vm13 }
 0x595   :  { %v1529_v22 = vsel %vm1526_vm11, %v1528_v1, %v1524_v7  ;;  %v1543_v48 = vsel %vm1542_vm10, %v1842_v56, %v1539_v60  ;;  %v1557_v13 = vsub.f32 1.0, %v1556_v62 }
 0x596   :  { %v1548_v8 = vsel %vm1545_vm12, %v1547_v3, %v1543_v48  ;;  %v1571_v12 = vmul.f32 %v1846_v5, %v1529_v22 }
 0x597   :  { %v1570_v20 = vmul.f32 %v1548_v8, %v3381_v10  ;;  %v1558_v6 = vmul.f32 %v1844_v42, %v1557_v13  ;;  %v1720_v10 = vld [vmem:[%s3448_s5] ss:$0 sm:$0xff] }
 0x599   :  { %v1572_v35 = vadd.f32 %v1571_v12, %v1570_v20  ;;  %v1559_v61 = vadd.f32 %v1844_v42, %v1558_v6 }
 0x59b   :  { %1847 = vtanh.f32 %v1572_v35  ;;  %v1563_v0 = vsel %vm1562_vm15, %v1844_v42, %v1559_v61 }
 0x59c   :  { %v1568_v63 = vsel %vm1565_vm0, %v1567_v11, %v1563_v0 }
 0x5a1   :  { %v1848_v47 = vpop.eup %1847 }
 0x5a2   :  { %v1574_v14 = vmul.f32 %v1848_v47, %v1568_v63 }
 0x5a4   :  { %1611 = vmatmul.f32.vlgmr.msrb.gmra.mxu0 %v1574_v14 }
 0x621   :  { %v1612_v17 = vpop.f32.mrf.mxu0 }
 0x622   :  { %v1613_v9 = vadd.f32 %v1720_v10, %v1612_v17 }
 0x624   :  { %1615 = vmax.xlane.f32.xlu0 %v1613_v9 }
 0x697   :  { %v1616_v15 = vpop.xlane.xlu0 %1615 }
 0x698   :  { %v1617_v21 = vsub.f32 %v1613_v9, %v1616_v15 }
 0x69a   :  { %v1618_v23 = vmul.f32 1.442695, %v1617_v21 }
 0x69c   :  { %1849 = vpow2.f32 %v1618_v23 }
 0x6a2   :  { %v1850_v4 = vpop.eup %1849 }
 0x6a3   :  { %1620 = vadd.xlane.f32.xlu0 %v1850_v4 }
 0x716   :  { %v1621_v2 = vpop.xlane.xlu0 %1620 }
 0x717   :  { %1851 = vlog2.f32 %v1621_v2 }
 0x71d   :  { %v1852_v16 = vpop.eup %1851 }
 0x71e   :  { %v1623_v24 = vmul.f32 0.6931472, %v1852_v16 }
 0x720   :  { %v1624_v25 = vadd.f32 %v1623_v24, %v1616_v15 }
 0x722   :  { %v1625_v26 = vsub.f32 %v1613_v9, %v1624_v25 }
 0x724   :  { %1626 = vst [vmem:[#allocation3] sm:$0xff] %v1625_v26 }
 0x725   :  { %1637 = dma.vmem_to_hbm [thread:$0]  %s1633_s22, 128, %s1635_s24, [#allocation4]  }
 0x726   :  { %1941 = dma.done.wait [#allocation4], 128  }
 0x727   :  { %1942 = vsyncadd [#allocation4], 4294967168 }
 0x728   :  { %1642 = vsyncpa [#allocation4], 1 }

</bundles_post_ra>
